<compile_context>
chip_gen: v6e
topology: v6e:2x2x1
jax: 0.10.0
libtpu: 0.0.40
codegen_flags: <defaults>
</compile_context>

<pallas_src>
import functools
import math

import jax
import jax.numpy as jnp
from jax.experimental import pallas as pl
from jax.experimental.pallas import tpu as pltpu


_VMEM_LIMIT = 32 * 1024 * 1024   # scoped-VMEM budget; safe on v5e/v6e/v7x


def _round_up(x, m):
    return ((x + m - 1) // m) * m


def _cdiv(a, b):
    return -(-a // b)


def _gelu_exact(x):
    # matches torch.nn.GELU() default (erf-based, not tanh approximation)
    return 0.5 * x * (1.0 + jax.lax.erf(x * (1.0 / math.sqrt(2.0))))


# ----------------------------------------------------------------------------
# Fused Conv1d kernel (channels-last, super-step layout, phase-decomposed MXU)
# ----------------------------------------------------------------------------
def _conv_kernel(*refs, n_phases, tm, t_out, apply_gelu, gn_apply, compute_stats):
    """One (batch, time-tile) grid step.

    Inputs : xm (1, tm, lanes) bf16            main window (output rows i*tm ..)
             xh (1, h_blk, lanes) bf16         halo rows      [only n_phases > 1]
             w  (n_phases, lanes, C_out) bf16  zero-padded phase weights
             sc, sh (1, 1, lanes) f32          fused GN scale/shift [only gn_apply]
    Outputs: o  (1, tm, C_out) bf16
             s0, s1 (1, 1, C_out) f32          per-channel sum / sumsq [only stats]
    """
    it = iter(refs)
    xm_ref = next(it)
    xh_ref = next(it) if n_phases > 1 else None
    w_ref = next(it)
    if gn_apply:
        sc_ref = next(it)
        sh_ref = next(it)
    o_ref = next(it)
    if compute_stats:
        s0_ref = next(it)
        s1_ref = next(it)

    def xform(x):
        # fused GroupNorm affine + GELU of the *previous* layer, applied to the
        # already-resident input tile (f32 math), then back to bf16 for the MXU.
        if gn_apply:
            xf = x.astype(jnp.float32) * sc_ref[0, 0, :] + sh_ref[0, 0, :]
            return _gelu_exact(xf).astype(jnp.bfloat16)
        return x

    xm = xform(xm_ref[0])                                         # (tm, lanes) bf16
    acc = jnp.dot(xm, w_ref[0], preferred_element_type=jnp.float32)
    if n_phases > 1:
        # aligned concat of main + halo; per phase do a full-window dot and shift
        # the f32 *result* rows with the XLU (roll) + a tile-aligned [:tm] slice,
        # so no unaligned bf16 slice copy is materialized.
        win = jnp.concatenate([xm, xform(xh_ref[0])], axis=0)     # (tm+h_blk, lanes)
        n_win = win.shape[0]
        for r in range(1, n_phases):
            full = jnp.dot(win, w_ref[r], preferred_element_type=jnp.float32)
            acc = acc + pltpu.roll(full, shift=n_win - r, axis=0)[:tm]
    if apply_gelu:
        acc = _gelu_exact(acc)

    i = pl.program_id(1)
    if compute_stats:
        @pl.when(i == 0)
        def _():
            s0_ref[...] = jnp.zeros_like(s0_ref)
            s1_ref[...] = jnp.zeros_like(s1_ref)

    # only tiles that straddle/exceed t_out pay the iota + select
    needs_mask = (i * tm + tm) > t_out

    @pl.when(jnp.logical_not(needs_mask))
    def _():
        o_ref[0] = acc.astype(o_ref.dtype)
        if compute_stats:
            s0_ref[...] += jnp.sum(acc, axis=0, keepdims=True)[None]
            s1_ref[...] += jnp.sum(acc * acc, axis=0, keepdims=True)[None]

    @pl.when(needs_mask)
    def _():
        row = i * tm + jax.lax.broadcasted_iota(jnp.int32, (tm, 1), 0)
        accm = jnp.where(row < t_out, acc, 0.0)
        o_ref[0] = accm.astype(o_ref.dtype)
        if compute_stats:
            s0_ref[...] += jnp.sum(accm, axis=0, keepdims=True)[None]
            s1_ref[...] += jnp.sum(accm * accm, axis=0, keepdims=True)[None]


def _phase_weights(w_oik, stride):
    """torch (C_out, C_in, k) -> (n_phases, stride*C_in, C_out) bf16 phase weights.
    Tap j lands in phase j // stride at lane offset (j % stride) * C_in; taps past
    k (when stride does not divide k) are zero."""
    c_out, c_in, k = w_oik.shape
    n_phases = (k - 1) // stride + 1
    w = jnp.transpose(w_oik, (2, 1, 0))                           # (k, C_in, C_out)
    w = jnp.pad(w, ((0, n_phases * stride - k), (0, 0), (0, 0)))
    w = w.reshape(n_phases, stride * c_in, c_out)
    return w.astype(jnp.bfloat16)


def _conv_layer_call(xs, weight_oik, plan, *, apply_gelu, gn_scale, gn_shift,
                     compute_stats):
    """One fused Conv1d layer.  xs: (B, T_super, stride*C_in) bf16 super-step input."""
    B, _, lanes = xs.shape
    c_out = weight_oik.shape[0]
    tm, n_m = plan["tm"], plan["n_m"]
    n_phases, h_blk, t_out = plan["n_phases"], plan["h_blk"], plan["t_out"]
    m_out = plan["m_out"]
    gn_apply = gn_scale is not None

    wp = _phase_weights(weight_oik, plan["s"])

    in_specs = [pl.BlockSpec((1, tm, lanes), lambda b, i: (b, i, 0))]
    inputs = [xs]
    if n_phases > 1:
        hb_ratio = tm // h_blk
        in_specs.append(pl.BlockSpec((1, h_blk, lanes),
                                     lambda b, i: (b, (i + 1) * hb_ratio, 0)))
        inputs.append(xs)                    # second (halo) view of the same array
    # NOTE: weight block is grid-invariant; pipeline_mode=pl.Buffered(1) would save
    # one VMEM copy of it -- left at the default for portability.
    in_specs.append(pl.BlockSpec((n_phases, lanes, c_out), lambda b, i: (0, 0, 0)))
    inputs.append(wp)
    if gn_apply:
        in_specs.append(pl.BlockSpec((1, 1, lanes), lambda b, i: (b, 0, 0)))
        in_specs.append(pl.BlockSpec((1, 1, lanes), lambda b, i: (b, 0, 0)))
        inputs.extend([gn_scale, gn_shift])

    # bf16 activations between layers (f32 accumulation stays in-kernel).
    # TODO(synk): pad C_out to a multiple of 128 for lane-dense stores when the
    #             model uses channel counts that are not already 128-aligned.
    out_shapes = [jax.ShapeDtypeStruct((B, m_out, c_out), jnp.bfloat16)]
    out_specs = [pl.BlockSpec((1, tm, c_out), lambda b, i: (b, i, 0))]
    if compute_stats:
        out_shapes += [jax.ShapeDtypeStruct((B, 1, c_out), jnp.float32)] * 2
        out_specs += [pl.BlockSpec((1, 1, c_out), lambda b, i: (b, 0, 0))] * 2

    kernel = functools.partial(
        _conv_kernel, n_phases=n_phases, tm=tm, t_out=t_out,
        apply_gelu=apply_gelu, gn_apply=gn_apply, compute_stats=compute_stats)

    time_sem = "arbitrary" if compute_stats else "parallel"
    outs = pl.pallas_call(
        kernel,
        out_shape=tuple(out_shapes),
        grid=(B, n_m),
        in_specs=in_specs,
        out_specs=tuple(out_specs),
        compiler_params=pltpu.CompilerParams(
            dimension_semantics=("parallel", time_sem),
            vmem_limit_bytes=_VMEM_LIMIT),
    )(*inputs)
    if compute_stats:
        y, s0, s1 = outs
        return y, (s0, s1)
    (y,) = outs
    return y, None


# ----------------------------------------------------------------------------
# Static tiling plan (per layer)
# ----------------------------------------------------------------------------
def _choose_tm(t_out, tm_target, h_blk, s_next):
    """Tile rows: multiple of 16 (bf16 sublanes), of the halo block (integral halo
    block index) and of the next layer's stride (so n_m*tm reshapes into its
    super-step layout with no padding)."""
    step = 16
    for m in (h_blk, s_next):
        if m > 1:
            step = step * m // math.gcd(step, m)
    tm = min(tm_target, _round_up(t_out, step))
    return _round_up(max(tm, step), step)


def _plan(cfgs, t_input, tm_target):
    """cfgs: list of (c_out, k, stride).  Planned backwards so each layer's padded
    output (m_out rows, rows >= t_out zeroed) already covers the next layer's read
    window and is divisible by its stride -> no pad/slice/copy between kernels."""
    t_valid = [t_input]
    for (_, k, s) in cfgs:
        t_out = (t_valid[-1] - k) // s + 1
        assert t_out > 0, "input too short for this conv stack"
        t_valid.append(t_out)

    plans = [None] * len(cfgs)
    need_rows = 0
    s_next = 1
    for L in range(len(cfgs) - 1, -1, -1):
        c_out, k, s = cfgs[L]
        t_out = t_valid[L + 1]
        halo = (k - 1) // s                       # extra super-rows past a tile
        n_phases = halo + 1
        h_blk = _round_up(halo, 16) if n_phases > 1 else 0
        tm = _choose_tm(t_out, tm_target, max(h_blk, 1), s_next)
        n_m = max(_cdiv(t_out, tm), 1)
        if need_rows:
            n_m = max(n_m, _cdiv(need_rows, tm))
        m_out = n_m * tm
        t_super = m_out + h_blk                   # input super-rows touched
        plans[L] = dict(c_out=c_out, k=k, s=s, t_out=t_out, n_phases=n_phases,
                        h_blk=h_blk, tm=tm, n_m=n_m, m_out=m_out,
                        t_super=t_super, t_in=t_super * s)
        need_rows = t_super * s
        s_next = s
    return plans


# ----------------------------------------------------------------------------
# Module: parameter init + forward
# ----------------------------------------------------------------------------
def init_conv_feature_extractor(key, conv_layers, in_channels=1):
    """conv_layers: list of (dim, kernel, stride).  Kaiming-normal conv weights in
    torch layout (C_out, C_in, k); GroupNorm affine on block 0 (mode='default')."""
    params = []
    in_d = in_channels
    for i, (dim, k, stride) in enumerate(conv_layers):
        key, sub = jax.random.split(key)
        std = math.sqrt(2.0 / (in_d * k))          # kaiming_normal_ (fan_in, a=0)
        w = std * jax.random.normal(sub, (dim, in_d, k), jnp.float32)
        layer = {"weight": w, "stride": int(stride)}
        if i == 0:
            layer["gn_gamma"] = jnp.ones((dim,), jnp.float32)
            layer["gn_beta"] = jnp.zeros((dim,), jnp.float32)
        params.append(layer)
        in_d = dim
    return params


def conv_feature_extractor_forward(params, x_nct, *, tm_target=512, eps=1e-5):
    """x_nct: (B, in_channels, T) float32 -> (B, dim_last, T_out) float32."""
    B, _, T = x_nct.shape
    cfgs = [(int(p["weight"].shape[0]), int(p["weight"].shape[2]), int(p["stride"]))
            for p in params]
    plans = _plan(cfgs, T, tm_target)

    # channels-last once; pad the (tiny) raw input to layer 0's read window.
    x = jnp.transpose(x_nct, (0, 2, 1)).astype(jnp.bfloat16)
    t_in0 = plans[0]["t_in"]
    if t_in0 > T:
        x = jnp.pad(x, ((0, 0), (0, t_in0 - T), (0, 0)))
    elif t_in0 < T:
        x = x[:, :t_in0, :]

    pending_gn = None          # (scale, shift) of shape (B, C): GN awaiting fusion
    for layer, plan in zip(params, plans):
        s = plan["s"]
        xs = x.reshape(B, x.shape[1] // s, s * x.shape[2])   # contiguous bitcast
        gn_scale = gn_shift = None
        if pending_gn is not None:
            sc, sh = pending_gn
            gn_scale = jnp.tile(sc, (1, s))[:, None, :]       # (B, 1, s*C_prev)
            gn_shift = jnp.tile(sh, (1, s))[:, None, :]
            pending_gn = None

        has_gn = "gn_gamma" in layer
        # Dropout(p=0.0) is a no-op and is omitted.
        x, stats = _conv_layer_call(
            xs, layer["weight"], plan,
            apply_gelu=not has_gn,        # GN layer defers GELU into the fused apply
            gn_scale=gn_scale, gn_shift=gn_shift,
            compute_stats=has_gn)

        if has_gn:
            # tiny (B, C) epilogue: fold mean/var/affine into scale & shift which
            # the next layer's kernel applies to its input tiles.
            sum_x, sum_xx = stats
            inv_n = 1.0 / plan["t_out"]
            mean = sum_x[:, 0, :] * inv_n
            # TODO(synk): E[x^2]-E[x]^2 in f32 can cancel for very long sequences
            # with large per-channel means; switch to per-tile Welford if needed.
            var = sum_xx[:, 0, :] * inv_n - mean * mean
            rstd = jax.lax.rsqrt(var + eps)
            g = layer["gn_gamma"].astype(jnp.float32)[None, :]
            b = layer["gn_beta"].astype(jnp.float32)[None, :]
            sc = rstd * g
            pending_gn = (sc, b - mean * sc)

    t_final = plans[-1]["t_out"]
    y = x[:, :t_final, :].astype(jnp.float32)
    if pending_gn is not None:            # GN sat on the last layer: plain-JAX apply
        sc, sh = pending_gn
        y = _gelu_exact(y * sc[:, None, :] + sh[:, None, :])
    return jnp.transpose(y, (0, 2, 1))    # back to NCT like torch


# ----------------------------------------------------------------------------
# Pure-JAX reference with the same precision policy (bf16 MXU inputs and
# inter-layer activations, f32 accumulation / GroupNorm / GELU math).
# ----------------------------------------------------------------------------
def _reference_forward(params, x_nct, eps=1e-5):
    x = x_nct
    for layer in params:
        w, s = layer["weight"], layer["stride"]
        y = jax.lax.conv_general_dilated(
            x.astype(jnp.bfloat16), w.astype(jnp.bfloat16),
            window_strides=(s,), padding="VALID",
            dimension_numbers=("NCH", "OIH", "NCH"),
            preferred_element_type=jnp.float32)
        if "gn_gamma" in layer:
            mean = jnp.mean(y, axis=-1, keepdims=True)
            var = jnp.mean(y * y, axis=-1, keepdims=True) - mean * mean
            rstd = jax.lax.rsqrt(var + eps)
            g = layer["gn_gamma"][None, :, None]
            b = layer["gn_beta"][None, :, None]
            y_q = y.astype(jnp.bfloat16).astype(jnp.float32)   # bf16 storage of conv out
            y = jax.nn.gelu(y_q * (rstd * g) + (b - mean * rstd * g), approximate=False)
        else:
            y = jax.nn.gelu(y, approximate=False)
        x = y.astype(jnp.bfloat16).astype(jnp.float32)         # bf16 inter-layer storage
    return x


# ----------------------------------------------------------------------------
if __name__ == "__main__":
    key = jax.random.PRNGKey(0)
    k_x, k_p = jax.random.split(key)

    # small wav2vec-like config: three conv blocks, GroupNorm on the first
    conv_layers = [(32, 4, 2), (48, 3, 2), (64, 2, 2)]
    B, C_in, T = 2, 1, 128
    x = jax.random.normal(k_x, (B, C_in, T), jnp.float32)
    params = init_conv_feature_extractor(k_p, conv_layers, in_channels=C_in)

    fwd = jax.jit(functools.partial(conv_feature_extractor_forward, params))
    y = jax.block_until_ready(fwd(x))

    y_ref = _reference_forward(params, x)
    assert y.shape == y_ref.shape, (y.shape, y_ref.shape)
    max_err = float(jnp.max(jnp.abs(y - y_ref)))
    # both paths store bf16 activations; residual diff is f32 accumulation order
    # plus occasional 1-ulp bf16 rounding flips -> 1e-2 tolerance is comfortable.
    assert jnp.allclose(y, y_ref, rtol=1e-2, atol=1e-2), max_err

    print("KERNEL_OK")
</pallas_src>

<mosaic_0001>
module attributes {stable_mosaic.version = 11 : i64} {
  func.func @_conv_kernel(%arg0: i32, %arg1: i32, %arg2: memref<1x64x2xbf16, #tpu.memory_space<vmem>>, %arg3: memref<1x16x2xbf16, #tpu.memory_space<vmem>>, %arg4: memref<2x2x32xbf16, #tpu.memory_space<vmem>>, %arg5: memref<1x64x32xbf16, #tpu.memory_space<vmem>>, %arg6: memref<1x1x32xf32, #tpu.memory_space<vmem>>, %arg7: memref<1x1x32xf32, #tpu.memory_space<vmem>>) attributes {dimension_semantics = [#tpu.dimension_semantics<parallel>, #tpu.dimension_semantics<arbitrary>], iteration_bounds = array<i64: 2, 2>, scalar_prefetch = 0 : i64, scratch_operands = 0 : i64, tpu.core_type = #tpu.core_type<tc>, window_params = [{transform_indices = @transform_0, window_bounds = array<i64: 1, 64, 2>}, {transform_indices = @transform_1, window_bounds = array<i64: 1, 16, 2>}, {pipeline_mode = #tpu.pipeline_mode<synchronous>, transform_indices = @transform_2, window_bounds = array<i64: 2, 2, 32>}, {transform_indices = @transform_3, window_bounds = array<i64: 1, 64, 32>}, {transform_indices = @transform_4, window_bounds = array<i64: 1, 1, 32>}, {transform_indices = @transform_5, window_bounds = array<i64: 1, 1, 32>}]} {
    %c0 = arith.constant 0 : index
    %c0_0 = arith.constant 0 : index
    %c0_1 = arith.constant 0 : index
    %0 = vector.load %arg2[%c0, %c0_0, %c0_1] : memref<1x64x2xbf16, #tpu.memory_space<vmem>>, vector<1x64x2xbf16>
    %1 = vector.shape_cast %0 : vector<1x64x2xbf16> to vector<64x2xbf16>
    %c0_2 = arith.constant 0 : index
    %c0_3 = arith.constant 0 : index
    %c0_4 = arith.constant 0 : index
    %2 = vector.load %arg4[%c0_2, %c0_3, %c0_4] : memref<2x2x32xbf16, #tpu.memory_space<vmem>>, vector<1x2x32xbf16>
    %3 = vector.shape_cast %2 : vector<1x2x32xbf16> to vector<2x32xbf16>
    %cst = arith.constant dense<0.000000e+00> : vector<64x32xf32>
    %4 = tpu.matmul %1, %3, %cst {dimension_numbers = #tpu.dot_dimension_numbers<[1], [0], [0], [1], [0, 0, 1, 1], [], []>} : vector<64x2xbf16>, vector<2x32xbf16>, vector<64x32xf32> -> vector<64x32xf32>
    %c0_5 = arith.constant 0 : index
    %c0_6 = arith.constant 0 : index
    %c0_7 = arith.constant 0 : index
    %5 = vector.load %arg3[%c0_5, %c0_6, %c0_7] : memref<1x16x2xbf16, #tpu.memory_space<vmem>>, vector<1x16x2xbf16>
    %6 = vector.shape_cast %5 : vector<1x16x2xbf16> to vector<16x2xbf16>
    %7 = tpu.concatenate %1, %6 in 0 : vector<64x2xbf16>, vector<16x2xbf16> -> vector<80x2xbf16>
    %c1 = arith.constant 1 : index
    %c0_8 = arith.constant 0 : index
    %c0_9 = arith.constant 0 : index
    %8 = vector.load %arg4[%c1, %c0_8, %c0_9] : memref<2x2x32xbf16, #tpu.memory_space<vmem>>, vector<1x2x32xbf16>
    %9 = vector.shape_cast %8 : vector<1x2x32xbf16> to vector<2x32xbf16>
    %cst_10 = arith.constant dense<0.000000e+00> : vector<80x32xf32>
    %10 = tpu.matmul %7, %9, %cst_10 {dimension_numbers = #tpu.dot_dimension_numbers<[1], [0], [0], [1], [0, 0, 1, 1], [], []>} : vector<80x2xbf16>, vector<2x32xbf16>, vector<80x32xf32> -> vector<80x32xf32>
    %c79_i32 = arith.constant 79 : i32
    %11 = tpu.dynamic_rotate %10 by %c79_i32 dim 0 : vector<80x32xf32>, i32 -> vector<80x32xf32>
    %12 = vector.extract_strided_slice %11 {offsets = [0, 0], sizes = [64, 32], strides = [1, 1]} : vector<80x32xf32> to vector<64x32xf32>
    %13 = arith.addf %4, %12 : vector<64x32xf32>
    %c0_i32 = arith.constant 0 : i32
    %14 = arith.cmpi eq, %arg1, %c0_i32 : i32
    %15 = arith.extui %14 : i1 to i32
    %c0_i32_11 = arith.constant 0 : i32
    %16 = arith.cmpi ne, %15, %c0_i32_11 : i32
    scf.if %16 {
      %cst_15 = arith.constant 0.000000e+00 : f32
      %25 = vector.broadcast %cst_15 : f32 to vector<1x1x32xf32>
      %c0_16 = arith.constant 0 : index
      %c0_17 = arith.constant 0 : index
      %c0_18 = arith.constant 0 : index
      %26 = vector.load %arg6[%c0_16, %c0_17, %c0_18] : memref<1x1x32xf32, #tpu.memory_space<vmem>>, vector<1x1x32xf32>
      tpu.vector_store %arg6[%c0_16, %c0_17, %c0_18], %25 {strides = array<i32>} : memref<1x1x32xf32, #tpu.memory_space<vmem>>, vector<1x1x32xf32>,
      %cst_19 = arith.constant 0.000000e+00 : f32
      %27 = vector.broadcast %cst_19 : f32 to vector<1x1x32xf32>
      %c0_20 = arith.constant 0 : index
      %c0_21 = arith.constant 0 : index
      %c0_22 = arith.constant 0 : index
      %28 = vector.load %arg7[%c0_20, %c0_21, %c0_22] : memref<1x1x32xf32, #tpu.memory_space<vmem>>, vector<1x1x32xf32>
      tpu.vector_store %arg7[%c0_20, %c0_21, %c0_22], %27 {strides = array<i32>} : memref<1x1x32xf32, #tpu.memory_space<vmem>>, vector<1x1x32xf32>,
    } else {
    }
    %c64_i32 = arith.constant 64 : i32
    %17 = arith.muli %arg1, %c64_i32 : i32
    %c64_i32_12 = arith.constant 64 : i32
    %18 = arith.addi %17, %c64_i32_12 : i32
    %c63_i32 = arith.constant 63 : i32
    %19 = arith.cmpi sgt, %18, %c63_i32 : i32
    %true = arith.constant true
    %20 = arith.xori %19, %true : i1
    %21 = arith.extui %20 : i1 to i32
    %c0_i32_13 = arith.constant 0 : i32
    %22 = arith.cmpi ne, %21, %c0_i32_13 : i32
    scf.if %22 {
      %25 = arith.truncf %13 : vector<64x32xf32> to vector<64x32xbf16>
      %c0_15 = arith.constant 0 : index
      %c0_16 = arith.constant 0 : index
      %c0_17 = arith.constant 0 : index
      %26 = vector.load %arg5[%c0_15, %c0_16, %c0_17] : memref<1x64x32xbf16, #tpu.memory_space<vmem>>, vector<1x64x32xbf16>
      %27 = vector.shape_cast %26 : vector<1x64x32xbf16> to vector<64x32xbf16>
      %28 = vector.shape_cast %25 : vector<64x32xbf16> to vector<1x64x32xbf16>
      tpu.vector_store %arg5[%c0_15, %c0_16, %c0_17], %28 {strides = array<i32>} : memref<1x64x32xbf16, #tpu.memory_space<vmem>>, vector<1x64x32xbf16>,
      %c0_18 = arith.constant 0 : index
      %c0_19 = arith.constant 0 : index
      %c0_20 = arith.constant 0 : index
      %29 = vector.load %arg6[%c0_18, %c0_19, %c0_20] : memref<1x1x32xf32, #tpu.memory_space<vmem>>, vector<1x1x32xf32>
      %cst_21 = arith.constant dense<0.000000e+00> : vector<32xf32>
      %30 = vector.multi_reduction <add>, %13, %cst_21 [0] : vector<64x32xf32> to vector<32xf32>
      %31 = vector.shape_cast %30 : vector<32xf32> to vector<1x32xf32>
      %32 = vector.shape_cast %31 : vector<1x32xf32> to vector<1x1x32xf32>
      %33 = arith.addf %29, %32 : vector<1x1x32xf32>
      %c0_22 = arith.constant 0 : index
      %c0_23 = arith.constant 0 : index
      %c0_24 = arith.constant 0 : index
      %34 = vector.load %arg6[%c0_22, %c0_23, %c0_24] : memref<1x1x32xf32, #tpu.memory_space<vmem>>, vector<1x1x32xf32>
      tpu.vector_store %arg6[%c0_22, %c0_23, %c0_24], %33 {strides = array<i32>} : memref<1x1x32xf32, #tpu.memory_space<vmem>>, vector<1x1x32xf32>,
      %c0_25 = arith.constant 0 : index
      %c0_26 = arith.constant 0 : index
      %c0_27 = arith.constant 0 : index
      %35 = vector.load %arg7[%c0_25, %c0_26, %c0_27] : memref<1x1x32xf32, #tpu.memory_space<vmem>>, vector<1x1x32xf32>
      %36 = arith.mulf %13, %13 : vector<64x32xf32>
      %cst_28 = arith.constant dense<0.000000e+00> : vector<32xf32>
      %37 = vector.multi_reduction <add>, %36, %cst_28 [0] : vector<64x32xf32> to vector<32xf32>
      %38 = vector.shape_cast %37 : vector<32xf32> to vector<1x32xf32>
      %39 = vector.shape_cast %38 : vector<1x32xf32> to vector<1x1x32xf32>
      %40 = arith.addf %35, %39 : vector<1x1x32xf32>
      %c0_29 = arith.constant 0 : index
      %c0_30 = arith.constant 0 : index
      %c0_31 = arith.constant 0 : index
      %41 = vector.load %arg7[%c0_29, %c0_30, %c0_31] : memref<1x1x32xf32, #tpu.memory_space<vmem>>, vector<1x1x32xf32>
      tpu.vector_store %arg7[%c0_29, %c0_30, %c0_31], %40 {strides = array<i32>} : memref<1x1x32xf32, #tpu.memory_space<vmem>>, vector<1x1x32xf32>,
    } else {
    }
    %23 = arith.extui %19 : i1 to i32
    %c0_i32_14 = arith.constant 0 : i32
    %24 = arith.cmpi ne, %23, %c0_i32_14 : i32
    scf.if %24 {
      %c64_i32_15 = arith.constant 64 : i32
      %25 = arith.muli %arg1, %c64_i32_15 : i32
      %26 = tpu.iota {dimensions = array<i32: 0>} : vector<64x1xi32>
      %27 = vector.broadcast %25 : i32 to vector<64x1xi32>
      %28 = arith.addi %27, %26 : vector<64x1xi32>
      %c63_i32_16 = arith.constant 63 : i32
      %29 = vector.broadcast %c63_i32_16 : i32 to vector<64x1xi32>
      %30 = arith.cmpi slt, %28, %29 : vector<64x1xi32>
      %cst_17 = arith.constant 0.000000e+00 : f32
      %31 = vector.shape_cast %30 : vector<64x1xi1> to vector<64x1xi1>
      %32 = vector.broadcast %31 : vector<64x1xi1> to vector<64x32xi1>
      %33 = vector.broadcast %cst_17 : f32 to vector<64x32xf32>
      %34 = arith.select %32, %13, %33 : vector<64x32xi1>, vector<64x32xf32>
      %35 = arith.truncf %34 : vector<64x32xf32> to vector<64x32xbf16>
      %c0_18 = arith.constant 0 : index
      %c0_19 = arith.constant 0 : index
      %c0_20 = arith.constant 0 : index
      %36 = vector.load %arg5[%c0_18, %c0_19, %c0_20] : memref<1x64x32xbf16, #tpu.memory_space<vmem>>, vector<1x64x32xbf16>
      %37 = vector.shape_cast %36 : vector<1x64x32xbf16> to vector<64x32xbf16>
      %38 = vector.shape_cast %35 : vector<64x32xbf16> to vector<1x64x32xbf16>
      tpu.vector_store %arg5[%c0_18, %c0_19, %c0_20], %38 {strides = array<i32>} : memref<1x64x32xbf16, #tpu.memory_space<vmem>>, vector<1x64x32xbf16>,
      %c0_21 = arith.constant 0 : index
      %c0_22 = arith.constant 0 : index
      %c0_23 = arith.constant 0 : index
      %39 = vector.load %arg6[%c0_21, %c0_22, %c0_23] : memref<1x1x32xf32, #tpu.memory_space<vmem>>, vector<1x1x32xf32>
      %cst_24 = arith.constant dense<0.000000e+00> : vector<32xf32>
      %40 = vector.multi_reduction <add>, %34, %cst_24 [0] : vector<64x32xf32> to vector<32xf32>
      %41 = vector.shape_cast %40 : vector<32xf32> to vector<1x32xf32>
      %42 = vector.shape_cast %41 : vector<1x32xf32> to vector<1x1x32xf32>
      %43 = arith.addf %39, %42 : vector<1x1x32xf32>
      %c0_25 = arith.constant 0 : index
      %c0_26 = arith.constant 0 : index
      %c0_27 = arith.constant 0 : index
      %44 = vector.load %arg6[%c0_25, %c0_26, %c0_27] : memref<1x1x32xf32, #tpu.memory_space<vmem>>, vector<1x1x32xf32>
      tpu.vector_store %arg6[%c0_25, %c0_26, %c0_27], %43 {strides = array<i32>} : memref<1x1x32xf32, #tpu.memory_space<vmem>>, vector<1x1x32xf32>,
      %c0_28 = arith.constant 0 : index
      %c0_29 = arith.constant 0 : index
      %c0_30 = arith.constant 0 : index
      %45 = vector.load %arg7[%c0_28, %c0_29, %c0_30] : memref<1x1x32xf32, #tpu.memory_space<vmem>>, vector<1x1x32xf32>
      %46 = arith.mulf %34, %34 : vector<64x32xf32>
      %cst_31 = arith.constant dense<0.000000e+00> : vector<32xf32>
      %47 = vector.multi_reduction <add>, %46, %cst_31 [0] : vector<64x32xf32> to vector<32xf32>
      %48 = vector.shape_cast %47 : vector<32xf32> to vector<1x32xf32>
      %49 = vector.shape_cast %48 : vector<1x32xf32> to vector<1x1x32xf32>
      %50 = arith.addf %45, %49 : vector<1x1x32xf32>
      %c0_32 = arith.constant 0 : index
      %c0_33 = arith.constant 0 : index
      %c0_34 = arith.constant 0 : index
      %51 = vector.load %arg7[%c0_32, %c0_33, %c0_34] : memref<1x1x32xf32, #tpu.memory_space<vmem>>, vector<1x1x32xf32>
      tpu.vector_store %arg7[%c0_32, %c0_33, %c0_34], %50 {strides = array<i32>} : memref<1x1x32xf32, #tpu.memory_space<vmem>>, vector<1x1x32xf32>,
    } else {
    }
    return
  }
  func.func @transform_0(%arg0: i32, %arg1: i32) -> (i32, i32, i32) {
    %c0_i32 = arith.constant 0 : i32
    %c0_i32_0 = arith.constant 0 : i32
    return %arg0, %arg1, %c0_i32 : i32, i32, i32
  }
  func.func @transform_1(%arg0: i32, %arg1: i32) -> (i32, i32, i32) {
    %c1_i32 = arith.constant 1 : i32
    %0 = arith.addi %arg1, %c1_i32 : i32
    %c4_i32 = arith.constant 4 : i32
    %1 = arith.muli %0, %c4_i32 : i32
    %c0_i32 = arith.constant 0 : i32
    %c0_i32_0 = arith.constant 0 : i32
    return %arg0, %1, %c0_i32 : i32, i32, i32
  }
  func.func @transform_2(%arg0: i32, %arg1: i32) -> (i32, i32, i32) {
    %c0_i32 = arith.constant 0 : i32
    %c0_i32_0 = arith.constant 0 : i32
    %c0_i32_1 = arith.constant 0 : i32
    %c0_i32_2 = arith.constant 0 : i32
    return %c0_i32, %c0_i32_0, %c0_i32_1 : i32, i32, i32
  }
  func.func @transform_3(%arg0: i32, %arg1: i32) -> (i32, i32, i32) {
    %c0_i32 = arith.constant 0 : i32
    %c0_i32_0 = arith.constant 0 : i32
    return %arg0, %arg1, %c0_i32 : i32, i32, i32
  }
  func.func @transform_4(%arg0: i32, %arg1: i32) -> (i32, i32, i32) {
    %c0_i32 = arith.constant 0 : i32
    %c0_i32_0 = arith.constant 0 : i32
    %c0_i32_1 = arith.constant 0 : i32
    return %arg0, %c0_i32, %c0_i32_0 : i32, i32, i32
  }
  func.func @transform_5(%arg0: i32, %arg1: i32) -> (i32, i32, i32) {
    %c0_i32 = arith.constant 0 : i32
    %c0_i32_0 = arith.constant 0 : i32
    %c0_i32_1 = arith.constant 0 : i32
    return %arg0, %c0_i32, %c0_i32_0 : i32, i32, i32
  }
}

module attributes {stable_mosaic.version = 11 : i64} {
  func.func @_conv_kernel(%arg0: i32, %arg1: i32, %arg2: memref<1x32x64xbf16, #tpu.memory_space<vmem>>, %arg3: memref<1x16x64xbf16, #tpu.memory_space<vmem>>, %arg4: memref<2x64x48xbf16, #tpu.memory_space<vmem>>, %arg5: memref<1x1x64xf32, #tpu.memory_space<vmem>>, %arg6: memref<1x1x64xf32, #tpu.memory_space<vmem>>, %arg7: memref<1x32x48xbf16, #tpu.memory_space<vmem>>) attributes {dimension_semantics = [#tpu.dimension_semantics<parallel>, #tpu.dimension_semantics<parallel>], iteration_bounds = array<i64: 2, 1>, scalar_prefetch = 0 : i64, scratch_operands = 0 : i64, tpu.core_type = #tpu.core_type<tc>, window_params = [{transform_indices = @transform_0, window_bounds = array<i64: 1, 32, 64>}, {transform_indices = @transform_1, window_bounds = array<i64: 1, 16, 64>}, {pipeline_mode = #tpu.pipeline_mode<synchronous>, transform_indices = @transform_2, window_bounds = array<i64: 2, 64, 48>}, {transform_indices = @transform_3, window_bounds = array<i64: 1, 1, 64>}, {transform_indices = @transform_4, window_bounds = array<i64: 1, 1, 64>}, {transform_indices = @transform_5, window_bounds = array<i64: 1, 32, 48>}]} {
    %c0 = arith.constant 0 : index
    %c0_0 = arith.constant 0 : index
    %c0_1 = arith.constant 0 : index
    %0 = vector.load %arg2[%c0, %c0_0, %c0_1] : memref<1x32x64xbf16, #tpu.memory_space<vmem>>, vector<1x32x64xbf16>
    %1 = vector.shape_cast %0 : vector<1x32x64xbf16> to vector<32x64xbf16>
    %2 = arith.extf %1 : vector<32x64xbf16> to vector<32x64xf32>
    %c0_2 = arith.constant 0 : index
    %c0_3 = arith.constant 0 : index
    %c0_4 = arith.constant 0 : index
    %3 = vector.load %arg5[%c0_2, %c0_3, %c0_4] : memref<1x1x64xf32, #tpu.memory_space<vmem>>, vector<1x1x64xf32>
    %4 = vector.shape_cast %3 : vector<1x1x64xf32> to vector<64xf32>
    %5 = vector.shape_cast %4 : vector<64xf32> to vector<1x64xf32>
    %6 = vector.broadcast %5 : vector<1x64xf32> to vector<32x64xf32>
    %7 = arith.mulf %2, %6 : vector<32x64xf32>
    %c0_5 = arith.constant 0 : index
    %c0_6 = arith.constant 0 : index
    %c0_7 = arith.constant 0 : index
    %8 = vector.load %arg6[%c0_5, %c0_6, %c0_7] : memref<1x1x64xf32, #tpu.memory_space<vmem>>, vector<1x1x64xf32>
    %9 = vector.shape_cast %8 : vector<1x1x64xf32> to vector<64xf32>
    %10 = vector.shape_cast %9 : vector<64xf32> to vector<1x64xf32>
    %11 = vector.broadcast %10 : vector<1x64xf32> to vector<32x64xf32>
    %12 = arith.addf %7, %11 : vector<32x64xf32>
    %cst = arith.constant 5.000000e-01 : f32
    %13 = vector.broadcast %cst : f32 to vector<32x64xf32>
    %14 = arith.mulf %13, %12 : vector<32x64xf32>
    %cst_8 = arith.constant 0.707106769 : f32
    %15 = vector.broadcast %cst_8 : f32 to vector<32x64xf32>
    %16 = arith.mulf %12, %15 : vector<32x64xf32>
    %17 = math.erf %16 : vector<32x64xf32>
    %cst_9 = arith.constant 1.000000e+00 : f32
    %18 = vector.broadcast %cst_9 : f32 to vector<32x64xf32>
    %19 = arith.addf %18, %17 : vector<32x64xf32>
    %20 = arith.mulf %14, %19 : vector<32x64xf32>
    %21 = arith.truncf %20 : vector<32x64xf32> to vector<32x64xbf16>
    %c0_10 = arith.constant 0 : index
    %c0_11 = arith.constant 0 : index
    %c0_12 = arith.constant 0 : index
    %22 = vector.load %arg4[%c0_10, %c0_11, %c0_12] : memref<2x64x48xbf16, #tpu.memory_space<vmem>>, vector<1x64x48xbf16>
    %23 = vector.shape_cast %22 : vector<1x64x48xbf16> to vector<64x48xbf16>
    %cst_13 = arith.constant dense<0.000000e+00> : vector<32x48xf32>
    %24 = tpu.matmul %21, %23, %cst_13 {dimension_numbers = #tpu.dot_dimension_numbers<[1], [0], [0], [1], [0, 0, 1, 1], [], []>} : vector<32x64xbf16>, vector<64x48xbf16>, vector<32x48xf32> -> vector<32x48xf32>
    %c0_14 = arith.constant 0 : index
    %c0_15 = arith.constant 0 : index
    %c0_16 = arith.constant 0 : index
    %25 = vector.load %arg3[%c0_14, %c0_15, %c0_16] : memref<1x16x64xbf16, #tpu.memory_space<vmem>>, vector<1x16x64xbf16>
    %26 = vector.shape_cast %25 : vector<1x16x64xbf16> to vector<16x64xbf16>
    %27 = arith.extf %26 : vector<16x64xbf16> to vector<16x64xf32>
    %c0_17 = arith.constant 0 : index
    %c0_18 = arith.constant 0 : index
    %c0_19 = arith.constant 0 : index
    %28 = vector.load %arg5[%c0_17, %c0_18, %c0_19] : memref<1x1x64xf32, #tpu.memory_space<vmem>>, vector<1x1x64xf32>
    %29 = vector.shape_cast %28 : vector<1x1x64xf32> to vector<64xf32>
    %30 = vector.shape_cast %29 : vector<64xf32> to vector<1x64xf32>
    %31 = vector.broadcast %30 : vector<1x64xf32> to vector<16x64xf32>
    %32 = arith.mulf %27, %31 : vector<16x64xf32>
    %c0_20 = arith.constant 0 : index
    %c0_21 = arith.constant 0 : index
    %c0_22 = arith.constant 0 : index
    %33 = vector.load %arg6[%c0_20, %c0_21, %c0_22] : memref<1x1x64xf32, #tpu.memory_space<vmem>>, vector<1x1x64xf32>
    %34 = vector.shape_cast %33 : vector<1x1x64xf32> to vector<64xf32>
    %35 = vector.shape_cast %34 : vector<64xf32> to vector<1x64xf32>
    %36 = vector.broadcast %35 : vector<1x64xf32> to vector<16x64xf32>
    %37 = arith.addf %32, %36 : vector<16x64xf32>
    %cst_23 = arith.constant 5.000000e-01 : f32
    %38 = vector.broadcast %cst_23 : f32 to vector<16x64xf32>
    %39 = arith.mulf %38, %37 : vector<16x64xf32>
    %cst_24 = arith.constant 0.707106769 : f32
    %40 = vector.broadcast %cst_24 : f32 to vector<16x64xf32>
    %41 = arith.mulf %37, %40 : vector<16x64xf32>
    %42 = math.erf %41 : vector<16x64xf32>
    %cst_25 = arith.constant 1.000000e+00 : f32
    %43 = vector.broadcast %cst_25 : f32 to vector<16x64xf32>
    %44 = arith.addf %43, %42 : vector<16x64xf32>
    %45 = arith.mulf %39, %44 : vector<16x64xf32>
    %46 = arith.truncf %45 : vector<16x64xf32> to vector<16x64xbf16>
    %47 = tpu.concatenate %21, %46 in 0 : vector<32x64xbf16>, vector<16x64xbf16> -> vector<48x64xbf16>
    %c1 = arith.constant 1 : index
    %c0_26 = arith.constant 0 : index
    %c0_27 = arith.constant 0 : index
    %48 = vector.load %arg4[%c1, %c0_26, %c0_27] : memref<2x64x48xbf16, #tpu.memory_space<vmem>>, vector<1x64x48xbf16>
    %49 = vector.shape_cast %48 : vector<1x64x48xbf16> to vector<64x48xbf16>
    %cst_28 = arith.constant dense<0.000000e+00> : vector<48x48xf32>
    %50 = tpu.matmul %47, %49, %cst_28 {dimension_numbers = #tpu.dot_dimension_numbers<[1], [0], [0], [1], [0, 0, 1, 1], [], []>} : vector<48x64xbf16>, vector<64x48xbf16>, vector<48x48xf32> -> vector<48x48xf32>
    %c47_i32 = arith.constant 47 : i32
    %51 = tpu.dynamic_rotate %50 by %c47_i32 dim 0 : vector<48x48xf32>, i32 -> vector<48x48xf32>
    %52 = vector.extract_strided_slice %51 {offsets = [0, 0], sizes = [32, 48], strides = [1, 1]} : vector<48x48xf32> to vector<32x48xf32>
    %53 = arith.addf %24, %52 : vector<32x48xf32>
    %cst_29 = arith.constant 5.000000e-01 : f32
    %54 = vector.broadcast %cst_29 : f32 to vector<32x48xf32>
    %55 = arith.mulf %54, %53 : vector<32x48xf32>
    %cst_30 = arith.constant 0.707106769 : f32
    %56 = vector.broadcast %cst_30 : f32 to vector<32x48xf32>
    %57 = arith.mulf %53, %56 : vector<32x48xf32>
    %58 = math.erf %57 : vector<32x48xf32>
    %cst_31 = arith.constant 1.000000e+00 : f32
    %59 = vector.broadcast %cst_31 : f32 to vector<32x48xf32>
    %60 = arith.addf %59, %58 : vector<32x48xf32>
    %61 = arith.mulf %55, %60 : vector<32x48xf32>
    %c32_i32 = arith.constant 32 : i32
    %62 = arith.muli %arg1, %c32_i32 : i32
    %c32_i32_32 = arith.constant 32 : i32
    %63 = arith.addi %62, %c32_i32_32 : i32
    %c31_i32 = arith.constant 31 : i32
    %64 = arith.cmpi sgt, %63, %c31_i32 : i32
    %true = arith.constant true
    %65 = arith.xori %64, %true : i1
    %66 = arith.extui %65 : i1 to i32
    %c0_i32 = arith.constant 0 : i32
    %67 = arith.cmpi ne, %66, %c0_i32 : i32
    scf.if %67 {
      %70 = arith.truncf %61 : vector<32x48xf32> to vector<32x48xbf16>
      %c0_34 = arith.constant 0 : index
      %c0_35 = arith.constant 0 : index
      %c0_36 = arith.constant 0 : index
      %71 = vector.load %arg7[%c0_34, %c0_35, %c0_36] : memref<1x32x48xbf16, #tpu.memory_space<vmem>>, vector<1x32x48xbf16>
      %72 = vector.shape_cast %71 : vector<1x32x48xbf16> to vector<32x48xbf16>
      %73 = vector.shape_cast %70 : vector<32x48xbf16> to vector<1x32x48xbf16>
      tpu.vector_store %arg7[%c0_34, %c0_35, %c0_36], %73 {strides = array<i32>} : memref<1x32x48xbf16, #tpu.memory_space<vmem>>, vector<1x32x48xbf16>,
    } else {
    }
    %68 = arith.extui %64 : i1 to i32
    %c0_i32_33 = arith.constant 0 : i32
    %69 = arith.cmpi ne, %68, %c0_i32_33 : i32
    scf.if %69 {
      %c32_i32_34 = arith.constant 32 : i32
      %70 = arith.muli %arg1, %c32_i32_34 : i32
      %71 = tpu.iota {dimensions = array<i32: 0>} : vector<32x1xi32>
      %72 = vector.broadcast %70 : i32 to vector<32x1xi32>
      %73 = arith.addi %72, %71 : vector<32x1xi32>
      %c31_i32_35 = arith.constant 31 : i32
      %74 = vector.broadcast %c31_i32_35 : i32 to vector<32x1xi32>
      %75 = arith.cmpi slt, %73, %74 : vector<32x1xi32>
      %cst_36 = arith.constant 0.000000e+00 : f32
      %76 = vector.shape_cast %75 : vector<32x1xi1> to vector<32x1xi1>
      %77 = vector.broadcast %76 : vector<32x1xi1> to vector<32x48xi1>
      %78 = vector.broadcast %cst_36 : f32 to vector<32x48xf32>
      %79 = arith.select %77, %61, %78 : vector<32x48xi1>, vector<32x48xf32>
      %80 = arith.truncf %79 : vector<32x48xf32> to vector<32x48xbf16>
      %c0_37 = arith.constant 0 : index
      %c0_38 = arith.constant 0 : index
      %c0_39 = arith.constant 0 : index
      %81 = vector.load %arg7[%c0_37, %c0_38, %c0_39] : memref<1x32x48xbf16, #tpu.memory_space<vmem>>, vector<1x32x48xbf16>
      %82 = vector.shape_cast %81 : vector<1x32x48xbf16> to vector<32x48xbf16>
      %83 = vector.shape_cast %80 : vector<32x48xbf16> to vector<1x32x48xbf16>
      tpu.vector_store %arg7[%c0_37, %c0_38, %c0_39], %83 {strides = array<i32>} : memref<1x32x48xbf16, #tpu.memory_space<vmem>>, vector<1x32x48xbf16>,
    } else {
    }
    return
  }
  func.func @transform_0(%arg0: i32, %arg1: i32) -> (i32, i32, i32) {
    %c0_i32 = arith.constant 0 : i32
    %c0_i32_0 = arith.constant 0 : i32
    return %arg0, %arg1, %c0_i32 : i32, i32, i32
  }
  func.func @transform_1(%arg0: i32, %arg1: i32) -> (i32, i32, i32) {
    %c1_i32 = arith.constant 1 : i32
    %0 = arith.addi %arg1, %c1_i32 : i32
    %c2_i32 = arith.constant 2 : i32
    %1 = arith.muli %0, %c2_i32 : i32
    %c0_i32 = arith.constant 0 : i32
    %c0_i32_0 = arith.constant 0 : i32
    return %arg0, %1, %c0_i32 : i32, i32, i32
  }
  func.func @transform_2(%arg0: i32, %arg1: i32) -> (i32, i32, i32) {
    %c0_i32 = arith.constant 0 : i32
    %c0_i32_0 = arith.constant 0 : i32
    %c0_i32_1 = arith.constant 0 : i32
    %c0_i32_2 = arith.constant 0 : i32
    return %c0_i32, %c0_i32_0, %c0_i32_1 : i32, i32, i32
  }
  func.func @transform_3(%arg0: i32, %arg1: i32) -> (i32, i32, i32) {
    %c0_i32 = arith.constant 0 : i32
    %c0_i32_0 = arith.constant 0 : i32
    %c0_i32_1 = arith.constant 0 : i32
    return %arg0, %c0_i32, %c0_i32_0 : i32, i32, i32
  }
  func.func @transform_4(%arg0: i32, %arg1: i32) -> (i32, i32, i32) {
    %c0_i32 = arith.constant 0 : i32
    %c0_i32_0 = arith.constant 0 : i32
    %c0_i32_1 = arith.constant 0 : i32
    return %arg0, %c0_i32, %c0_i32_0 : i32, i32, i32
  }
  func.func @transform_5(%arg0: i32, %arg1: i32) -> (i32, i32, i32) {
    %c0_i32 = arith.constant 0 : i32
    %c0_i32_0 = arith.constant 0 : i32
    return %arg0, %arg1, %c0_i32 : i32, i32, i32
  }
}

module attributes {stable_mosaic.version = 11 : i64} {
  func.func @_conv_kernel(%arg0: i32, %arg1: i32, %arg2: memref<1x16x96xbf16, #tpu.memory_space<vmem>>, %arg3: memref<1x96x64xbf16, #tpu.memory_space<vmem>>, %arg4: memref<1x16x64xbf16, #tpu.memory_space<vmem>>) attributes {dimension_semantics = [#tpu.dimension_semantics<parallel>, #tpu.dimension_semantics<parallel>], iteration_bounds = array<i64: 2, 1>, scalar_prefetch = 0 : i64, scratch_operands = 0 : i64, tpu.core_type = #tpu.core_type<tc>, window_params = [{transform_indices = @transform_0, window_bounds = array<i64: 1, 16, 96>}, {pipeline_mode = #tpu.pipeline_mode<synchronous>, transform_indices = @transform_1, window_bounds = array<i64: 1, 96, 64>}, {transform_indices = @transform_2, window_bounds = array<i64: 1, 16, 64>}]} {
    %c0 = arith.constant 0 : index
    %c0_0 = arith.constant 0 : index
    %c0_1 = arith.constant 0 : index
    %0 = vector.load %arg2[%c0, %c0_0, %c0_1] : memref<1x16x96xbf16, #tpu.memory_space<vmem>>, vector<1x16x96xbf16>
    %1 = vector.shape_cast %0 : vector<1x16x96xbf16> to vector<16x96xbf16>
    %c0_2 = arith.constant 0 : index
    %c0_3 = arith.constant 0 : index
    %c0_4 = arith.constant 0 : index
    %2 = vector.load %arg3[%c0_2, %c0_3, %c0_4] : memref<1x96x64xbf16, #tpu.memory_space<vmem>>, vector<1x96x64xbf16>
    %3 = vector.shape_cast %2 : vector<1x96x64xbf16> to vector<96x64xbf16>
    %cst = arith.constant dense<0.000000e+00> : vector<16x64xf32>
    %4 = tpu.matmul %1, %3, %cst {dimension_numbers = #tpu.dot_dimension_numbers<[1], [0], [0], [1], [0, 0, 1, 1], [], []>} : vector<16x96xbf16>, vector<96x64xbf16>, vector<16x64xf32> -> vector<16x64xf32>
    %cst_5 = arith.constant 5.000000e-01 : f32
    %5 = vector.broadcast %cst_5 : f32 to vector<16x64xf32>
    %6 = arith.mulf %5, %4 : vector<16x64xf32>
    %cst_6 = arith.constant 0.707106769 : f32
    %7 = vector.broadcast %cst_6 : f32 to vector<16x64xf32>
    %8 = arith.mulf %4, %7 : vector<16x64xf32>
    %9 = math.erf %8 : vector<16x64xf32>
    %cst_7 = arith.constant 1.000000e+00 : f32
    %10 = vector.broadcast %cst_7 : f32 to vector<16x64xf32>
    %11 = arith.addf %10, %9 : vector<16x64xf32>
    %12 = arith.mulf %6, %11 : vector<16x64xf32>
    %c16_i32 = arith.constant 16 : i32
    %13 = arith.muli %arg1, %c16_i32 : i32
    %c16_i32_8 = arith.constant 16 : i32
    %14 = arith.addi %13, %c16_i32_8 : i32
    %c15_i32 = arith.constant 15 : i32
    %15 = arith.cmpi sgt, %14, %c15_i32 : i32
    %true = arith.constant true
    %16 = arith.xori %15, %true : i1
    %17 = arith.extui %16 : i1 to i32
    %c0_i32 = arith.constant 0 : i32
    %18 = arith.cmpi ne, %17, %c0_i32 : i32
    scf.if %18 {
      %21 = arith.truncf %12 : vector<16x64xf32> to vector<16x64xbf16>
      %c0_10 = arith.constant 0 : index
      %c0_11 = arith.constant 0 : index
      %c0_12 = arith.constant 0 : index
      %22 = vector.load %arg4[%c0_10, %c0_11, %c0_12] : memref<1x16x64xbf16, #tpu.memory_space<vmem>>, vector<1x16x64xbf16>
      %23 = vector.shape_cast %22 : vector<1x16x64xbf16> to vector<16x64xbf16>
      %24 = vector.shape_cast %21 : vector<16x64xbf16> to vector<1x16x64xbf16>
      tpu.vector_store %arg4[%c0_10, %c0_11, %c0_12], %24 {strides = array<i32>} : memref<1x16x64xbf16, #tpu.memory_space<vmem>>, vector<1x16x64xbf16>,
    } else {
    }
    %19 = arith.extui %15 : i1 to i32
    %c0_i32_9 = arith.constant 0 : i32
    %20 = arith.cmpi ne, %19, %c0_i32_9 : i32
    scf.if %20 {
      %c16_i32_10 = arith.constant 16 : i32
      %21 = arith.muli %arg1, %c16_i32_10 : i32
      %22 = tpu.iota {dimensions = array<i32: 0>} : vector<16x1xi32>
      %23 = vector.broadcast %21 : i32 to vector<16x1xi32>
      %24 = arith.addi %23, %22 : vector<16x1xi32>
      %c15_i32_11 = arith.constant 15 : i32
      %25 = vector.broadcast %c15_i32_11 : i32 to vector<16x1xi32>
      %26 = arith.cmpi slt, %24, %25 : vector<16x1xi32>
      %cst_12 = arith.constant 0.000000e+00 : f32
      %27 = vector.shape_cast %26 : vector<16x1xi1> to vector<16x1xi1>
      %28 = vector.broadcast %27 : vector<16x1xi1> to vector<16x64xi1>
      %29 = vector.broadcast %cst_12 : f32 to vector<16x64xf32>
      %30 = arith.select %28, %12, %29 : vector<16x64xi1>, vector<16x64xf32>
      %31 = arith.truncf %30 : vector<16x64xf32> to vector<16x64xbf16>
      %c0_13 = arith.constant 0 : index
      %c0_14 = arith.constant 0 : index
      %c0_15 = arith.constant 0 : index
      %32 = vector.load %arg4[%c0_13, %c0_14, %c0_15] : memref<1x16x64xbf16, #tpu.memory_space<vmem>>, vector<1x16x64xbf16>
      %33 = vector.shape_cast %32 : vector<1x16x64xbf16> to vector<16x64xbf16>
      %34 = vector.shape_cast %31 : vector<16x64xbf16> to vector<1x16x64xbf16>
      tpu.vector_store %arg4[%c0_13, %c0_14, %c0_15], %34 {strides = array<i32>} : memref<1x16x64xbf16, #tpu.memory_space<vmem>>, vector<1x16x64xbf16>,
    } else {
    }
    return
  }
  func.func @transform_0(%arg0: i32, %arg1: i32) -> (i32, i32, i32) {
    %c0_i32 = arith.constant 0 : i32
    %c0_i32_0 = arith.constant 0 : i32
    return %arg0, %arg1, %c0_i32 : i32, i32, i32
  }
  func.func @transform_1(%arg0: i32, %arg1: i32) -> (i32, i32, i32) {
    %c0_i32 = arith.constant 0 : i32
    %c0_i32_0 = arith.constant 0 : i32
    %c0_i32_1 = arith.constant 0 : i32
    %c0_i32_2 = arith.constant 0 : i32
    return %c0_i32, %c0_i32_0, %c0_i32_1 : i32, i32, i32
  }
  func.func @transform_2(%arg0: i32, %arg1: i32) -> (i32, i32, i32) {
    %c0_i32 = arith.constant 0 : i32
    %c0_i32_0 = arith.constant 0 : i32
    return %arg0, %arg1, %c0_i32 : i32, i32, i32
  }
}

</mosaic_0001>

<bundles_post_ra>
// kernel: conv_feature_extractor_forward.5
= control target key start
LH: loop header
LB: loop body
LE: loop exit
PB: predicated region body
PF: predicated region fallthrough
CT: control target
= control target key end

     0   :  { %s557_s9 = smov 0   ;;  %s559_s10 = smov 0   ;;  %s615_s0 = inlined_call_operand.vmem [shape: bf16[2,16,96], index: 0, kind: input, shape index: {}]   ;;  %s616_s1 = inlined_call_operand.vmem [shape: bf16[1,96,64], index: 1, kind: input, shape index: {}]   ;;  %s617_s2 = inlined_call_operand.vmem [shape: bf16[2,16,64], index: 2, kind: output, shape index: {}]  }
   0x1   :  { %s561_s11 = smov 0  }
   0x2 LB: > { %s24_s12 = sadd.s32 1, %s534_s10  ;;  %p431_p0 = scmp.ge.s32.totalorder %s538_s11, 1  ;;  %s538_s11 = sphi %s561_s11, %s12_s11   ;;  %s534_s10 = sphi %s559_s10, %s619_s10   ;;  %s530_s9 = sphi %s557_s9, %s618_s9  }
   0x3   : > { %p26_p1 = scmp.ge.s32.totalorder %s24_s12, 2  ;;  %p133_p2 = scmp.lt.s32.totalorder %s538_s11, 3 }
   0x5   : > { %s621_s12 = smov (%p26_p1, %s24_s12), 0  ;;  %p134_p3 = pnand %p431_p0, %p133_p2 }
   0x6   : > { %p164_p4 = scmp.lt.s32.totalorder (!%p134_p3), %s530_s9, 1 }
   0x7   : > { %137 = sbr.rel (%p134_p3) target bundleno = 258 (0x102), region = 28 }
   0xc   : > { %v505_v0 = vld [vmem:[%s616_s1 + $0x28] sm:$0xff]   ;;  %v540_v1 = vmov 0.0   ;;  %v506_v2 = vld [vmem:[%s616_s1 + $0x20] sm:$0xff]   ;;  %vm541_vm0 = vmmov 0   ;;  %s623_s9 = smov (!%p164_p4, %s530_s9), 1  ;;  %v507_v3 = vld [vmem:[%s616_s1 + $0x18] sm:$0xff]   ;;  %v315_v14 = vlaneseq }
   0xd   : > { %463 = vmatprep.subr.bf16.mxu0 %v540_v1  ;;  %475 = vmatprep.mubr.msk.bf16.mxu0 %vm541_vm0, %v540_v1  ;;  %s450_s19 = sshll.u32 %s623_s9, 3  ;;  %v508_v4 = vld [vmem:[%s616_s1 + $0x10] sm:$0xff]   ;;  %v509_v5 = vld [vmem:[%s616_s1 + $0x8] sm:$0xff]   ;;  %v510_v6 = vld [vmem:[%s616_s1] sm:$0xff]   ;;  %vm239_vm1 = vcmask 785408   ;;  %vm337_vm2 = vcmask 519168  }
   0xe   : > { %464 = vmatpush3.bf16.msra.mxu0 %v505_v0  ;;  %s171_s22 = scalar_lea.vmem %s615_s0, %s450_s19  ;;  %v316_v15 = vshrl.u32 %v315_v14, 7  ;;  %s181_s3 = scalar_lea.vmem %s617_s2, %s450_s19 }
   0xf   : > { %465 = vmatprep.subr.bf16.mxu0 %v540_v1  ;;  %v511_v7 = vld [vmem:[%s171_s22] sm:$0xff]  }
  0x10   : > { %v317_v19 = vadd.s32 8, %v316_v15 }
  0x12   : > { %466 = vmatpush3.bf16.msra.mxu0 %v506_v2  ;;  %vm322_vm3 = vcmp.lt.s32.totalorder %v317_v19, 15 }
  0x13   : > { %467 = vmatprep.subr.bf16.mxu0 %v540_v1 }
  0x16   : > { %468 = vmatpush3.bf16.msra.mxu0 %v507_v3 }
  0x17   : > { %469 = vmatprep.subr.bf16.mxu0 %v540_v1 }
  0x1a   : > { %470 = vmatpush3.bf16.msra.mxu0 %v508_v4 }
  0x1b   : > { %471 = vmatprep.subr.bf16.mxu0 %v540_v1 }
  0x1e   : > { %472 = vmatpush3.bf16.msra.mxu0 %v509_v5 }
  0x1f   : > { %473 = vmatprep.subr.bf16.mxu0 %v540_v1 }
  0x22   : > { %474 = vmatpush3.bf16.msra.mxu0 %v510_v6 }
  0x25   : > { %476 = vmatmul.mubr.msk.bf16.vlgmr.msra.gmra.mxu0 %vm239_vm1, %v511_v7 }
  0xe5   : > { %v277_v8 = vpop.f32.mrf.mxu0 }
  0xe6   : > { %v286_v9 = vmul.f32 0.70710677, %v277_v8  ;;  %v284_v17 = vmul.f32 0.5, %v277_v8 }
  0xe7   : > { %v477_v10 = vpop.f32.mrf.mxu0 }
  0xe8   : > { %512 = verf.f32 %v286_v9 }
  0xe9   : > { %v280_v11 = vpop.f32.mrf.mxu0 }
  0xea   : > { %v287_v12 = vmul.f32 0.70710677, %v280_v11  ;;  %v285_v23 = vmul.f32 0.5, %v280_v11 }
  0xeb   : > { %v478_v13 = vpop.f32.mrf.mxu0 }
  0xec   : > { %514 = verf.f32 %v287_v12 }
  0xf5   : > { %v513_v16 = vpop.eup %512 }
  0xf6   : > { %v290_v18 = vadd.f32 1.0, %v513_v16 }
  0xf8   : > { %v292_v20 = vmul.f32 %v290_v18, %v284_v17 }
  0xf9   : > { %v515_v21 = vpop.eup %514 }
  0xfa   : > { %v454_v22 = vpack.c.bf16 %v292_v20, %v292_v20  ;;  %v291_v24 = vadd.f32 1.0, %v515_v21 }
  0xfc   : > { %338 = vst.msk [vmem:[%s181_s3] sm:$0xf] %vm337_vm2, %v454_v22  ;;  %v293_v25 = vmul.f32 %v291_v24, %v285_v23 }
  0xfe   : > { %v328_v26 = vsel %vm322_vm3, %v293_v25, 0.0 }
  0xff   : > { %v455_v27 = vpack.c.bf16 %v328_v26, %v328_v26 }
 0x101   : > { %339 = vst.msk [vmem:[%s181_s3 + $0x4] sm:$0xf] %vm337_vm2, %v455_v27 }
 0x102 PF: > { %s12_s11 = sadd.s32 1, %s538_s11   ;;  %s618_s9 = smov %s534_s10 }
 0x103   : > { %p9_p5 = scmp.ge.s32.totalorder %s12_s11, 4   ;;  %s619_s10 = smov %s621_s12 }
 0x105   :  { %11 = sbr.rel (!%p9_p5) target bundleno = 2 (0x2), region = 66 }

// kernel: conv_feature_extractor_forward.4
= control target key start
LH: loop header
LB: loop body
LE: loop exit
PB: predicated region body
PF: predicated region fallthrough
CT: control target
= control target key end

     0   :  { %s1050_s18 = smov 0   ;;  %s1052_s19 = smov 0   ;;  %s1145_s0 = inlined_call_operand.vmem [shape: bf16[2,64,64], index: 0, kind: input, shape index: {}, may-alias: {0,1}]   ;;  %s1146_s1 = inlined_call_operand.vmem [shape: bf16[2,64,64], index: 1, kind: input, shape index: {}, may-alias: {0,1}]   ;;  %s1147_s2 = inlined_call_operand.vmem [shape: bf16[2,64,48], index: 2, kind: input, shape index: {}]   ;;  %s1148_s3 = inlined_call_operand.vmem [shape: f32[2,1,64], index: 3, kind: input, shape index: {}]   ;;  %s1149_s4 = inlined_call_operand.vmem [shape: f32[2,1,64], index: 4, kind: input, shape index: {}]   ;;  %s1150_s5 = inlined_call_operand.vmem [shape: bf16[2,32,48], index: 5, kind: output, shape index: {}]  }
   0x1   :  { %s1054_s20 = smov 0  }
   0x2 LB: > { %s27_s21 = sadd.s32 1, %s1012_s19  ;;  %p829_p0 = scmp.ge.s32.totalorder %s1016_s20, 1  ;;  %s1016_s20 = sphi %s1054_s20, %s15_s20   ;;  %s1012_s19 = sphi %s1052_s19, %s1152_s19   ;;  %s1008_s18 = sphi %s1050_s18, %s1151_s18  }
   0x3   : > { %p29_p1 = scmp.ge.s32.totalorder %s27_s21, 2  ;;  %p249_p2 = scmp.lt.s32.totalorder %s1016_s20, 3 }
   0x5   : > { %s1154_s21 = smov (%p29_p1, %s27_s21), 0  ;;  %p250_p3 = pnand %p829_p0, %p249_p2 }
   0x6   : > { %p303_p4 = scmp.lt.s32.totalorder (!%p250_p3), %s1008_s18, 1 }
   0x7   : > { %253 = sbr.rel (%p250_p3) target bundleno = 283 (0x11b), region = 40 }
   0xc   : > { %v966_v0 = vld [vmem:[%s1147_s2 + $0x38] sm:$0xff]   ;;  %v1018_v1 = vmov 0.0   ;;  %v967_v2 = vld [vmem:[%s1147_s2 + $0x30] sm:$0xff]   ;;  %vm1019_vm0 = vmmov 0   ;;  %s1156_s18 = smov (!%p303_p4, %s1008_s18), 1  ;;  %v969_v5 = vld [vmem:[%s1147_s2 + $0x28] sm:$0xff]  }
   0xd   : > { %908 = vmatprep.subr.bf16.mxu0 %v1018_v1  ;;  %v968_v3 = vld [vmem:[%s1147_s2 + $0x18] sm:$0xff]   ;;  %916 = vmatprep.mubr.msk.bf16.mxu0 %vm1019_vm0, %v1018_v1  ;;  %v970_v4 = vld [vmem:[%s1147_s2 + $0x10] sm:$0xff]   ;;  %v972_v6 = vld [vmem:[%s1147_s2 + $0x8] sm:$0xff]   ;;  %s869_s9 = sshll.u32 %s1156_s18, 5  ;;  %s328_s12 = scalar_lea.vmem %s1148_s3, %s1156_s18  ;;  %vm455_vm1 = vcmask 523264   ;;  %vm697_vm3 = vcmask 388096  }
   0xe   : > { %909 = vmatpush3.bf16.msra.mxu0 %v966_v0  ;;  %928 = vmatprep.subr.bf16.mxu1 %v968_v3  ;;  %s310_s15 = scalar_lea.vmem %s1145_s0, %s869_s9  ;;  %s331_s22 = scalar_lea.vmem %s1149_s4, %s1156_s18  ;;  %v836_v8 = vld [vmem:[%s328_s12] ss:$0 sm:$0xff] }
   0xf   : > { %910 = vmatprep.subr.bf16.mxu0 %v1018_v1  ;;  %929 = vmatpush3.bf16.msra.mxu1 %v968_v3  ;;  %v882_v7 = vld [vmem:[%s310_s15] sm:$0xff]   ;;  %s871_s23 = sadd.s32 16, %s869_s9  ;;  %v894_v12 = vld [vmem:[%s310_s15 + $0x8] sm:$0xff]   ;;  %s872_s6 = sshll.u32 %s1156_s18, 4 }
  0x10   : > { %930 = vmatprep.subr.bf16.mxu1 %v970_v4  ;;  %v971_v9 = vld [vmem:[%s1147_s2 + $0x20] sm:$0xff]   ;;  %v883_v10 = vunpack.c.l.bf16 %v882_v7  ;;  %v884_v11 = vunpack.c.h.bf16 %v882_v7  ;;  %s322_s28 = scalar_lea.vmem %s1146_s1, %s871_s23  ;;  %v887_v15 = vunpack.c.l.bf16 %v894_v12  ;;  %v888_v16 = vunpack.c.h.bf16 %v894_v12  ;;  %s340_s9 = scalar_lea.vmem %s1150_s5, %s872_s6 }
  0x11   : > { %v837_v13 = vld [vmem:[%s331_s22] ss:$0 sm:$0xff] }
  0x12   : > { %911 = vmatpush3.bf16.msra.mxu0 %v967_v2  ;;  %v973_v14 = vld [vmem:[%s1147_s2] sm:$0xff]   ;;  %v358_v18 = vmul.f32 %v883_v10, %v836_v8  ;;  %v359_v19 = vmul.f32 %v884_v11, %v836_v8  ;;  %v360_v22 = vmul.f32 %v887_v15, %v836_v8  ;;  %v361_v23 = vmul.f32 %v888_v16, %v836_v8 }
  0x13   : > { %912 = vmatprep.subr.bf16.mxu0 %v1018_v1  ;;  %931 = vmatpush3.bf16.msra.mxu1 %v970_v4  ;;  %v890_v17 = vld [vmem:[%s322_s28] sm:$0xff]   ;;  %v526_v2 = vlaneseq }
  0x14   : > { %932 = vmatprep.subr.bf16.mxu1 %v972_v6  ;;  %v891_v20 = vunpack.c.l.bf16 %v890_v17  ;;  %v892_v21 = vunpack.c.h.bf16 %v890_v17  ;;  %v369_v24 = vadd.f32 %v837_v13, %v358_v18  ;;  %v370_v25 = vadd.f32 %v837_v13, %v359_v19 }
  0x15   : > { %v371_v27 = vadd.f32 %v837_v13, %v360_v22  ;;  %v372_v28 = vadd.f32 %v837_v13, %v361_v23  ;;  %v527_v4 = vshrl.u32 %v526_v2, 7 }
  0x16   : > { %913 = vmatpush3.bf16.msra.mxu0 %v969_v5  ;;  %v407_v26 = vmul.f32 %v891_v20, %v836_v8  ;;  %v408_v29 = vmul.f32 %v892_v21, %v836_v8  ;;  %v377_v30 = vmul.f32 0.70710677, %v369_v24  ;;  %v378_v31 = vmul.f32 0.70710677, %v370_v25 }
  0x17   : > { %914 = vmatprep.subr.bf16.mxu0 %v1018_v1  ;;  %933 = vmatpush3.bf16.msra.mxu1 %v972_v6  ;;  %v379_v32 = vmul.f32 0.70710677, %v371_v27  ;;  %v380_v33 = vmul.f32 0.70710677, %v372_v28  ;;  %v373_v38 = vmul.f32 0.5, %v369_v24  ;;  %v374_v40 = vmul.f32 0.5, %v370_v25 }
  0x18   : > { %934 = vmatprep.subr.bf16.mxu1 %v973_v14  ;;  %974 = verf.f32 %v377_v30  ;;  %v409_v34 = vadd.f32 %v837_v13, %v407_v26  ;;  %v410_v35 = vadd.f32 %v837_v13, %v408_v29  ;;  %v375_v43 = vmul.f32 0.5, %v371_v27 }
  0x19   : > { %976 = verf.f32 %v378_v31  ;;  %v376_v46 = vmul.f32 0.5, %v372_v28  ;;  %vm528_vm2 = vcmp.lt.s32.totalorder %v527_v4, 7 }
  0x1a   : > { %915 = vmatpush3.bf16.msra.mxu0 %v971_v9  ;;  %978 = verf.f32 %v379_v32  ;;  %v413_v36 = vmul.f32 0.70710677, %v409_v34  ;;  %v414_v37 = vmul.f32 0.70710677, %v410_v35  ;;  %v411_v58 = vmul.f32 0.5, %v409_v34 }
  0x1b   : > { %935 = vmatpush3.bf16.msra.mxu1 %v973_v14  ;;  %980 = verf.f32 %v380_v33  ;;  %v412_v59 = vmul.f32 0.5, %v410_v35 }
  0x1c   : > { %982 = verf.f32 %v413_v36 }
  0x1d   : > { %984 = verf.f32 %v414_v37 }
  0x25   : > { %v975_v39 = vpop.eup %974 }
  0x26   : > { %v977_v41 = vpop.eup %976  ;;  %v385_v42 = vadd.f32 1.0, %v975_v39 }
  0x27   : > { %v979_v44 = vpop.eup %978  ;;  %v386_v45 = vadd.f32 1.0, %v977_v41 }
  0x28   : > { %v981_v47 = vpop.eup %980  ;;  %v389_v48 = vmul.f32 %v385_v42, %v373_v38  ;;  %v387_v49 = vadd.f32 1.0, %v979_v44 }
  0x29   : > { %v390_v50 = vmul.f32 %v386_v45, %v374_v40  ;;  %v388_v51 = vadd.f32 1.0, %v981_v47  ;;  %v983_v55 = vpop.eup %982 }
  0x2a   : > { %v391_v52 = vmul.f32 %v387_v49, %v375_v43  ;;  %v985_v57 = vpop.eup %984  ;;  %v417_v60 = vadd.f32 1.0, %v983_v55  ;;  %v659_v49 = vadd.s32 24, %v527_v4 }
  0x2b   : > { %v393_v53 = vpack.c.bf16 %v390_v50, %v389_v48  ;;  %v392_v54 = vmul.f32 %v388_v51, %v376_v46  ;;  %v418_v61 = vadd.f32 1.0, %v985_v57 }
  0x2c   : > { %v419_v62 = vmul.f32 %v417_v60, %v411_v58  ;;  %vm668_vm4 = vcmp.lt.s32.totalorder %v659_v49, 31 }
  0x2d   : > { %917 = vmatmul.mubr.msk.bf16.vlgmr.msra.gmra.mxu0 %vm455_vm1, %v393_v53  ;;  %936 = vmatprep.mubr.msk.bf16.mxu1 %vm455_vm1, %v393_v53  ;;  %v394_v56 = vpack.c.bf16 %v392_v54, %v391_v52  ;;  %v420_v63 = vmul.f32 %v418_v61, %v412_v59 }
  0x2e   : > { %920 = vmatprep.mubr.msk.bf16.mxu0 %vm1019_vm0, %v1018_v1 }
  0x2f   : > { %937 = vmatmul.mubr.msk.bf16.vlgmr.msra.gmra.mxu1 %vm455_vm1, %v394_v56  ;;  %v421_v0 = vpack.c.bf16 %v420_v63, %v419_v62 }
  0x35   : > { %921 = vmatmul.mubr.msk.bf16.gmra.mxu0 %vm455_vm1, %v394_v56 }
  0x36   : > { %924 = vmatprep.mubr.msk.bf16.mxu0 %vm1019_vm0, %v1018_v1 }
  0x3d   : > { %925 = vmatmul.mubr.msk.bf16.gmra.mxu0 %vm455_vm1, %v421_v0 }
  0xed   : > { %v499_v3 = vpop.f32.mrf.mxu0 }
  0xee   : > { %v521_v9 = vrot.slane %v499_v3, 1 }
  0xef   : > { %v918_v5 = vpop.f32.mrf.mxu0  ;;  %v938_v6 = vpop.f32.mrf.mxu1 }
  0xf1   : > { %v502_v7 = vpop.f32.mrf.mxu0  ;;  %v591_v8 = vpop.f32.mrf.mxu1 }
  0xf2   : > { %v522_v10 = vrot.slane %v502_v7, 1 }
  0xf3   : > { %v919_v11 = vpop.f32.mrf.mxu0  ;;  %v939_v12 = vpop.f32.mrf.mxu1 }
  0xf4   : > { %v532_v13 = vsel %vm528_vm2, %v521_v9, %v522_v10 }
  0xf5   : > { %v592_v14 = vadd.f32 %v591_v8, %v532_v13  ;;  %v507_v15 = vpop.f32.mrf.mxu0  ;;  %v594_v16 = vpop.f32.mrf.mxu1 }
  0xf6   : > { %v523_v1 = vrot.slane %v507_v15, 1 }
  0xf7   : > { %v610_v17 = vmul.f32 0.70710677, %v592_v14  ;;  %v922_v18 = vpop.f32.mrf.mxu0  ;;  %v606_v37 = vmul.f32 0.5, %v592_v14 }
  0xf8   : > { %v531_v19 = vsel %vm528_vm2, %v522_v10, %v523_v1 }
  0xf9   : > { %986 = verf.f32 %v610_v17  ;;  %v595_v20 = vadd.f32 %v594_v16, %v531_v19  ;;  %v510_v21 = vpop.f32.mrf.mxu0 }
  0xfa   : > { %v524_v22 = vrot.slane %v510_v21, 1 }
  0xfb   : > { %v611_v23 = vmul.f32 0.70710677, %v595_v20  ;;  %v923_v24 = vpop.f32.mrf.mxu0  ;;  %v607_v42 = vmul.f32 0.5, %v595_v20 }
  0xfc   : > { %v530_v25 = vsel %vm528_vm2, %v523_v1, %v524_v22 }
  0xfd   : > { %988 = verf.f32 %v611_v23  ;;  %v600_v26 = vadd.f32 %v938_v6, %v530_v25  ;;  %v515_v27 = vpop.f32.mrf.mxu0 }
  0xfe   : > { %v525_v28 = vrot.slane %v515_v27, 1 }
  0xff   : > { %v612_v29 = vmul.f32 0.70710677, %v600_v26  ;;  %v926_v30 = vpop.f32.mrf.mxu0  ;;  %v608_v47 = vmul.f32 0.5, %v600_v26 }
 0x100   : > { %v529_v31 = vsel %vm528_vm2, %v524_v22, %v525_v28 }
 0x101   : > { %990 = verf.f32 %v612_v29  ;;  %v603_v32 = vadd.f32 %v939_v12, %v529_v31  ;;  %v518_v33 = vpop.f32.mrf.mxu0 }
 0x103   : > { %v613_v34 = vmul.f32 0.70710677, %v603_v32  ;;  %v927_v35 = vpop.f32.mrf.mxu0  ;;  %v609_v53 = vmul.f32 0.5, %v603_v32 }
 0x105   : > { %992 = verf.f32 %v613_v34 }
 0x106   : > { %v987_v36 = vpop.eup %986 }
 0x107   : > { %v618_v38 = vadd.f32 1.0, %v987_v36 }
 0x109   : > { %v622_v39 = vmul.f32 %v618_v38, %v606_v37 }
 0x10a   : > { %v989_v40 = vpop.eup %988 }
 0x10b   : > { %v877_v41 = vpack.c.bf16 %v622_v39, %v622_v39  ;;  %v619_v43 = vadd.f32 1.0, %v989_v40 }
 0x10d   : > { %698 = vst.msk [vmem:[%s340_s9] sm:$0xf] %vm697_vm3, %v877_v41  ;;  %v623_v44 = vmul.f32 %v619_v43, %v607_v42 }
 0x10e   : > { %v991_v45 = vpop.eup %990 }
 0x10f   : > { %v878_v46 = vpack.c.bf16 %v623_v44, %v623_v44  ;;  %v620_v48 = vadd.f32 1.0, %v991_v45 }
 0x111   : > { %699 = vst.msk [vmem:[%s340_s9 + $0x4] sm:$0xf] %vm697_vm3, %v878_v46  ;;  %v624_v50 = vmul.f32 %v620_v48, %v608_v47 }
 0x112   : > { %v993_v51 = vpop.eup %992 }
 0x113   : > { %v879_v52 = vpack.c.bf16 %v624_v50, %v624_v50  ;;  %v621_v54 = vadd.f32 1.0, %v993_v51 }
 0x115   : > { %700 = vst.msk [vmem:[%s340_s9 + $0x8] sm:$0xf] %vm697_vm3, %v879_v52  ;;  %v625_v55 = vmul.f32 %v621_v54, %v609_v53 }
 0x117   : > { %v680_v56 = vsel %vm668_vm4, %v625_v55, 0.0 }
 0x118   : > { %v880_v57 = vpack.c.bf16 %v680_v56, %v680_v56 }
 0x11a   : > { %701 = vst.msk [vmem:[%s340_s9 + $0xc] sm:$0xf] %vm697_vm3, %v880_v57 }
 0x11b PF: > { %s15_s20 = sadd.s32 1, %s1016_s20   ;;  %s1151_s18 = smov %s1012_s19 }
 0x11c   : > { %p12_p5 = scmp.ge.s32.totalorder %s15_s20, 4   ;;  %s1152_s19 = smov %s1154_s21 }
 0x11e   :  { %14 = sbr.rel (!%p12_p5) target bundleno = 2 (0x2), region = 88 }

// kernel: conv_feature_extractor_forward.3
= control target key start
LH: loop header
LB: loop body
LE: loop exit
PB: predicated region body
PF: predicated region fallthrough
CT: control target
= control target key end

     0   :  { %s1236_s18 = smov 0   ;;  %s1238_s19 = smov 0   ;;  %s1524_s0 = inlined_call_operand.vmem [shape: bf16[2,144,2], index: 0, kind: input, shape index: {}, may-alias: {0,1}]   ;;  %s1525_s1 = inlined_call_operand.vmem [shape: bf16[2,144,2], index: 1, kind: input, shape index: {}, may-alias: {0,1}]   ;;  %s1526_s2 = inlined_call_operand.vmem [shape: bf16[2,2,32], index: 2, kind: input, shape index: {}]   ;;  %s1527_s3 = inlined_call_operand.vmem [shape: bf16[2,128,32], index: 3, kind: output, shape index: {0}]   ;;  %s1528_s4 = inlined_call_operand.vmem [shape: f32[2,1,32], index: 4, kind: output, shape index: {1}]   ;;  %s1529_s5 = inlined_call_operand.vmem [shape: f32[2,1,32], index: 5, kind: output, shape index: {2}]  }
   0x1   :  { %1530 = sst [smem:[#allocation3_spill]] %s1526_s2  ;;  %s1240_s20 = smov 0  }
   0x2   :  { %s1242_s21 = smov 0   ;;  %s1244_s22 = smov 0  }
   0x3 LB: > { %s25_s23 = sadd.s32 1, %s1193_s20  ;;  %s28_s24 = sadd.s32 1, %s1197_s21  ;;  %s1201_s22 = sphi %s1244_s22, %s16_s22   ;;  %s1197_s21 = sphi %s1242_s21, %s1537_s21   ;;  %s1193_s20 = sphi %s1240_s20, %s1536_s20   ;;  %s1189_s19 = sphi %s1238_s19, %s1535_s19   ;;  %s1185_s18 = sphi %s1236_s18, %s1534_s18  }
   0x4   : > { %p26_p0 = scmp.ge.s32.totalorder %s25_s23, 2  ;;  %p997_p1 = scmp.ge.s32.totalorder %s1201_s22, 1 }
   0x5   : > { %p246_p2 = scmp.lt.s32.totalorder %s1201_s22, 5 }
   0x6   : > { %s1539_s23 = smov (%p26_p0, %s25_s23), 0  ;;  %s1541_s24 = smov (!%p26_p0, %s28_s24), %s1197_s21 }
   0x7   : > { %p247_p3 = pnand %p997_p1, %p246_p2  ;;  %p30_p4 = scmp.ge.s32.totalorder %s1541_s24, 2 }
   0x8   : > { %s1532_s2 = sld [smem:[#allocation3_spill]] (!%p247_p3)  ;;  %s1274_s27 = sshll.u32 (!%p247_p3), %s1185_s18, 3 }
   0x9   : > { %s1543_s24 = smov (%p30_p4, %s1541_s24), 0  ;;  %250 = sbr.rel (%p247_p3) target bundleno = 341 (0x155), region = 32 }
   0xa   : > { %1531 = sst [smem:[#allocation2_spill]] %s1543_s24  ;;  %p308_p5 = scmp.lt.s32.totalorder (!%p247_p3), %s1189_s19, 1 }
   0xb   : > { %p310_p6 = scmp.lt.s32.totalorder (!%p247_p3), %s1274_s27, 17  ;;  %p338_p7 = scmp.lt.s32.totalorder (!%p247_p3), %s1274_s27, 15 }
   0xc   : > { %s1067_s30 = sadd.s32 (!%p247_p3), 8, %s1274_s27  ;;  %p1021_p9 = scmp.ne.s32.totalorder (!%p247_p3), %s1185_s18, 0 }
   0xd   : > { %p326_p8 = scmp.lt.s32.totalorder (!%p247_p3), %s1067_s30, 17 }
   0xe   : > { %v1011_v0 = vld [vmem:[%s1532_s2 + $0x1] sm:$0x1]  ;;  %vm406_vm0 = vcmask 1040384   ;;  %v1203_v1 = vmov 0.0   ;;  %v360_v3 = vld [vmem:[%s1532_s2] sm:$0x1]  ;;  %v491_v14 = vlaneseq }
   0xf   : > { %1079 = vmatprep.subr.bf16.mxu0 %v1203_v1  ;;  %1111 = vmatprep.subr.bf16.mxu1 %v1203_v1  ;;  %v408_v2 = vsel %vm406_vm0, %v1011_v0, 0  ;;  %vm1204_vm1 = vmmov 0   ;;  %s1545_s19 = smov (!%p308_p5, %s1189_s19), 1  ;;  %vm390_vm2 = vcmask 15360   ;;  %s1549_s30 = smov (!%p326_p8, %s1067_s30), 17  ;;  %v503_v7 = vsel %vm406_vm0, %v360_v3, 0 }
  0x10   : > { %1080 = vmatpush3.bf16.msra.mxu0 %v408_v2  ;;  %1112 = vmatpush3.bf16.msra.mxu1 %v408_v2  ;;  %s311_s6 = scalar_select %p310_p6, %s1274_s27, 17  ;;  %v1324_v19 = vshrl.u32 %v491_v14, 7 }
  0x11   : > { %1081 = vmatprep.mubr.msk.bf16.mxu0 %vm1204_vm1, %v1203_v1  ;;  %1097 = vmatprep.mubr.msk.bf16.mxu1 %vm1204_vm1, %v1203_v1  ;;  %s1114_s7 = smul.u32 18, %s1545_s19  ;;  %s1004_s8 = sshll.u32 %s1545_s19, 4 }
  0x12   : > { %1113 = vmatprep.subr.msk.bf16.mxu1 %vm406_vm0, %v360_v3  ;;  %s1547_s27 = smov (!%p338_p7, %s1274_s27), 15  ;;  %s1293_s12 = scalar_lea.vmem %s1528_s4, %s1545_s19  ;;  %vm493_vm3 = vcmp.lt.s32.totalorder %v1324_v19, 7 }
  0x13   : > { %s313_s9 = sadd.s32 %s1114_s7, %s311_s6  ;;  %s341_s14 = sadd.s32 %s1004_s8, %s1547_s27 }
  0x14   : > { %s999_s13 = sshll.u32 %s313_s9, 2  ;;  %s1005_s25 = sshll.u32 %s341_s14, 2 }
  0x15   : > { %s315_s17 = scalar_lea.vmem %s1524_s0, %s999_s13  ;;  %s1301_s29 = scalar_lea.vmem %s1527_s3, %s1005_s25 }
  0x16   : > { %s1306_s24 = scalar_lea.vmem %s1529_s5, %s1545_s19  ;;  %v1158_v4 = vld [vmem:[%s315_s17] sm:$0xff]   ;;  %s329_s27 = sadd.s32 %s1114_s7, %s1549_s30  ;;  %v1160_v5 = vld [vmem:[%s315_s17 + $0x8] sm:$0xff]   ;;  %v1161_v8 = vld [vmem:[%s315_s17 + $0x10] sm:$0xff]  }
  0x17   : > { %1082 = vmatmul.mubr.msk.bf16.vlgmr.msra.gmra.mxu0 %vm390_vm2, %v1158_v4  ;;  %s1002_s8 = sshll.u32 %s329_s27, 2  ;;  %v1162_v9 = vld [vmem:[%s315_s17 + $0x18] sm:$0xff]  }
  0x18   : > { %1085 = vmatprep.mubr.msk.bf16.mxu0 %vm1204_vm1, %v1203_v1  ;;  %s331_s11 = scalar_lea.vmem %s1525_s1, %s1002_s8 }
  0x19   : > { %v1159_v6 = vld [vmem:[%s331_s11] sm:$0xff]  }
  0x1a   : > { %1098 = vmatmul.mubr.msk.bf16.vlgmr.msra.gmra.mxu1 %vm390_vm2, %v1159_v6 }
  0x1b   : > { %1102 = vmatpush3.bf16.msra.mxu1 %v503_v7  ;;  %1103 = vmatprep.mubr.msk.bf16.mxu1 %vm390_vm2, %v1158_v4 }
  0x1f   : > { %1086 = vmatmul.mubr.msk.bf16.gmra.mxu0 %vm390_vm2, %v1160_v5 }
  0x20   : > { %1089 = vmatprep.mubr.msk.bf16.mxu0 %vm1204_vm1, %v1203_v1 }
  0x22   : > { %1104 = vmatmul.mubr.msk.bf16.vlgmr.msra.gmra.mxu1 %vm390_vm2, %v1160_v5 }
  0x23   : > { %1107 = vmatprep.mubr.msk.bf16.mxu1 %vm390_vm2, %v1161_v8 }
  0x27   : > { %1090 = vmatmul.mubr.msk.bf16.gmra.mxu0 %vm390_vm2, %v1161_v8 }
  0x28   : > { %1093 = vmatprep.mubr.msk.bf16.mxu0 %vm1204_vm1, %v1203_v1 }
  0x2a   : > { %1108 = vmatmul.mubr.msk.bf16.gmra.mxu1 %vm390_vm2, %v1162_v9 }
  0x2f   : > { %1094 = vmatmul.mubr.msk.bf16.gmra.mxu0 %vm390_vm2, %v1162_v9 }
  0xd7   : > { %v444_v10 = vpop.f32.mrf.mxu0 }
  0xd8   : > { %v482_v28 = vrot.slane %v444_v10, 1 }
  0xd9   : > { %v1083_v11 = vpop.f32.mrf.mxu0 }
  0xda   : > { %v476_v15 = vpop.f32.mrf.mxu1 }
  0xdb   : > { %v447_v12 = vpop.f32.mrf.mxu0  ;;  %v490_v56 = vrot.slane %v476_v15, 1 }
  0xdc   : > { %v1099_v17 = vpop.f32.mrf.mxu1  ;;  %v483_v24 = vrot.slane %v447_v12, 1 }
  0xdd   : > { %v1084_v13 = vpop.f32.mrf.mxu0 }
  0xde   : > { %v479_v20 = vpop.f32.mrf.mxu1  ;;  %v501_v33 = vsel %vm493_vm3, %v482_v28, %v483_v24 }
  0xdf   : > { %v452_v16 = vpop.f32.mrf.mxu0 }
  0xe0   : > { %v484_v22 = vrot.slane %v452_v16, 1  ;;  %v1100_v25 = vpop.f32.mrf.mxu1 }
  0xe1   : > { %v1087_v18 = vpop.f32.mrf.mxu0 }
  0xe2   : > { %v1105_v29 = vpop.f32.mrf.mxu1  ;;  %v500_v42 = vsel %vm493_vm3, %v483_v24, %v484_v22 }
  0xe3   : > { %v455_v21 = vpop.f32.mrf.mxu0 }
  0xe4   : > { %v485_v23 = vrot.slane %v455_v21, 1  ;;  %v539_v34 = vpop.f32.mrf.mxu1 }
  0xe5   : > { %v1088_v26 = vpop.f32.mrf.mxu0  ;;  %v1333_v36 = vadd.f32 %v539_v34, %v501_v33 }
  0xe6   : > { %v499_v27 = vsel %vm493_vm3, %v484_v22, %v485_v23  ;;  %v1106_v38 = vpop.f32.mrf.mxu1 }
  0xe7   : > { %v460_v30 = vpop.f32.mrf.mxu0  ;;  %v1329_v31 = vadd.f32 %v1105_v29, %v499_v27 }
  0xe8   : > { %v486_v32 = vrot.slane %v460_v30, 1  ;;  %v542_v43 = vpop.f32.mrf.mxu1 }
  0xe9   : > { %v1091_v35 = vpop.f32.mrf.mxu0  ;;  %v1341_v45 = vadd.f32 %v542_v43, %v500_v42 }
  0xea   : > { %v498_v37 = vsel %vm493_vm3, %v485_v23, %v486_v32  ;;  %v1109_v46 = vpop.f32.mrf.mxu1 }
  0xeb   : > { %v463_v39 = vpop.f32.mrf.mxu0  ;;  %v1337_v40 = vadd.f32 %v1106_v38, %v498_v37 }
  0xec   : > { %v487_v41 = vrot.slane %v463_v39, 1  ;;  %v555_v50 = vpop.f32.mrf.mxu1 }
  0xed   : > { %v1092_v44 = vpop.f32.mrf.mxu0 }
  0xee   : > { %v497_v47 = vsel %vm493_vm3, %v486_v32, %v487_v41  ;;  %v1110_v53 = vpop.f32.mrf.mxu1 }
  0xef   : > { %v468_v48 = vpop.f32.mrf.mxu0  ;;  %v1345_v52 = vadd.f32 %v555_v50, %v497_v47 }
  0xf0   : > { %v488_v49 = vrot.slane %v468_v48, 1  ;;  %v558_v58 = vpop.f32.mrf.mxu1 }
  0xf1   : > { %v1095_v51 = vpop.f32.mrf.mxu0 }
  0xf2   : > { %v496_v54 = vsel %vm493_vm3, %v487_v41, %v488_v49 }
  0xf3   : > { %v471_v55 = vpop.f32.mrf.mxu0  ;;  %v1349_v60 = vadd.f32 %v558_v58, %v496_v54  ;;  %573 = sbr.rel (%p1021_p9) target bundleno = 250 (0xfa), region = 36 }
  0xf4   : > { %v489_v57 = vrot.slane %v471_v55, 1 }
  0xf5   : > { %v1096_v59 = vpop.f32.mrf.mxu0 }
  0xf6   : > { %v494_v61 = vsel %vm493_vm3, %v489_v57, %v490_v56  ;;  %v495_v62 = vsel %vm493_vm3, %v488_v49, %v489_v57 }
  0xf7   : > { %v1355_v63 = vadd.f32 %v1109_v46, %v495_v62  ;;  %v1357_v0 = vadd.f32 %v1110_v53, %v494_v61 }
  0xf8   : > { %vm574_vm4 = vcmask 253952   ;;  %v1205_v1 = vmov 0.0  }
  0xf9   : > { %575 = vst.msk [vmem:[%s1293_s12] sm:$0x1] %vm574_vm4, %v1205_v1  ;;  %576 = vst.msk [vmem:[%s1306_s24] sm:$0x1] %vm574_vm4, %v1205_v1 }
  0xfa PF: > { %s1022_s2 = sshll.u32 %s1185_s18, 6 }
  0xfb   : > { %s1365_s19 = sadd.s32 64, %s1022_s2 }
  0xfc   : > { %p1023_p10 = scmp.gt.s32.totalorder %s1365_s19, 63 }
  0xfe   : > { %583 = sbr.rel (%p1023_p10) target bundleno = 295 (0x127), region = 40 }
 0x103   : > { %v1050_v2 = vpack.c.bf16 %v1333_v36, %v1333_v36  ;;  %vm616_vm5 = vcmask 257024   ;;  %v1051_v3 = vpack.c.bf16 %v1341_v45, %v1341_v45  ;;  %v1052_v4 = vpack.c.bf16 %v1329_v31, %v1329_v31  ;;  %v625_v1 = vld [vmem:[%s1293_s12] sm:$0x1] }
 0x104   : > { %v1053_v5 = vpack.c.bf16 %v1337_v40, %v1337_v40  ;;  %v1054_v6 = vpack.c.bf16 %v1345_v52, %v1345_v52  ;;  %v1055_v7 = vpack.c.bf16 %v1349_v60, %v1349_v60  ;;  %v1056_v8 = vpack.c.bf16 %v1355_v63, %v1355_v63 }
 0x105   : > { %617 = vst.msk [vmem:[%s1301_s29] sm:$0xf] %vm616_vm5, %v1050_v2  ;;  %618 = vst.msk [vmem:[%s1301_s29 + $0x4] sm:$0xf] %vm616_vm5, %v1051_v3  ;;  %v1057_v9 = vpack.c.bf16 %v1357_v0, %v1357_v0  ;;  %vm626_vm6 = vcmask 261120   ;;  %v652_v13 = vmul.f32 %v1333_v36, %v1333_v36  ;;  %v653_v16 = vmul.f32 %v1341_v45, %v1341_v45 }
 0x106   : > { %619 = vst.msk [vmem:[%s1301_s29 + $0x8] sm:$0xf] %vm616_vm5, %v1052_v4  ;;  %620 = vst.msk [vmem:[%s1301_s29 + $0xc] sm:$0xf] %vm616_vm5, %v1053_v5  ;;  %v627_v10 = vsel %vm626_vm6, %v1333_v36, 0.0  ;;  %v628_v11 = vsel %vm626_vm6, %v1341_v45, 0.0  ;;  %v654_v17 = vmul.f32 %v1329_v31, %v1329_v31  ;;  %v655_v18 = vmul.f32 %v1337_v40, %v1337_v40 }
 0x107   : > { %621 = vst.msk [vmem:[%s1301_s29 + $0x10] sm:$0xf] %vm616_vm5, %v1054_v6  ;;  %622 = vst.msk [vmem:[%s1301_s29 + $0x14] sm:$0xf] %vm616_vm5, %v1055_v7  ;;  %v630_v12 = vsel %vm626_vm6, %v1329_v31, 0.0  ;;  %v629_v14 = vadd.f32 %v628_v11, %v627_v10  ;;  %v632_v15 = vsel %vm626_vm6, %v1337_v40, 0.0  ;;  %v656_v22 = vmul.f32 %v1345_v52, %v1345_v52 }
 0x108   : > { %623 = vst.msk [vmem:[%s1301_s29 + $0x18] sm:$0xf] %vm616_vm5, %v1056_v8  ;;  %624 = vst.msk [vmem:[%s1301_s29 + $0x1c] sm:$0xf] %vm616_vm5, %v1057_v9  ;;  %v634_v21 = vsel %vm626_vm6, %v1345_v52, 0.0  ;;  %v660_v23 = vsel %vm626_vm6, %v652_v13, 0.0  ;;  %v657_v29 = vmul.f32 %v1349_v60, %v1349_v60  ;;  %v658_v35 = vmul.f32 %v1355_v63, %v1355_v63 }
 0x109   : > { %v631_v20 = vadd.f32 %v630_v12, %v629_v14  ;;  %v661_v24 = vsel %vm626_vm6, %v653_v16, 0.0  ;;  %v663_v25 = vsel %vm626_vm6, %v654_v17, 0.0  ;;  %v636_v28 = vsel %vm626_vm6, %v1349_v60, 0.0  ;;  %v651_v6 = vld [vmem:[%s1306_s24] sm:$0x1] }
 0x10a   : > { %v662_v27 = vadd.f32 %v661_v24, %v660_v23  ;;  %v665_v30 = vsel %vm626_vm6, %v655_v18, 0.0  ;;  %v638_v34 = vsel %vm626_vm6, %v1355_v63, 0.0  ;;  %v667_v37 = vsel %vm626_vm6, %v656_v22, 0.0 }
 0x10b   : > { %v633_v26 = vadd.f32 %v632_v15, %v631_v20  ;;  %v640_v41 = vsel %vm626_vm6, %v1357_v0, 0.0  ;;  %v659_v42 = vmul.f32 %v1357_v0, %v1357_v0  ;;  %v669_v43 = vsel %vm626_vm6, %v657_v29, 0.0 }
 0x10c   : > { %v664_v33 = vadd.f32 %v663_v25, %v662_v27  ;;  %v671_v47 = vsel %vm626_vm6, %v658_v35, 0.0  ;;  %vm649_vm7 = vcmask 253952  }
 0x10d   : > { %v635_v32 = vadd.f32 %v634_v21, %v633_v26  ;;  %v673_v50 = vsel %vm626_vm6, %v659_v42, 0.0 }
 0x10e   : > { %v666_v39 = vadd.f32 %v665_v30, %v664_v33 }
 0x10f   : > { %v637_v38 = vadd.f32 %v636_v28, %v635_v32 }
 0x110   : > { %v668_v46 = vadd.f32 %v667_v37, %v666_v39 }
 0x111   : > { %v639_v44 = vadd.f32 %v638_v34, %v637_v38 }
 0x112   : > { %v670_v49 = vadd.f32 %v669_v43, %v668_v46 }
 0x113   : > { %v641_v48 = vadd.f32 %v640_v41, %v639_v44 }
 0x114   : > { %v672_v53 = vadd.f32 %v671_v47, %v670_v49 }
 0x115   : > { %v642_v51 = vrot.slane %v641_v48, 4 }
 0x116   : > { %v674_v55 = vadd.f32 %v673_v50, %v672_v53 }
 0x117   : > { %v643_v54 = vadd.f32 %v642_v51, %v641_v48 }
 0x118   : > { %v675_v57 = vrot.slane %v674_v55, 4 }
 0x119   : > { %v644_v56 = vrot.slane %v643_v54, 2 }
 0x11a   : > { %v676_v59 = vadd.f32 %v675_v57, %v674_v55 }
 0x11b   : > { %v645_v58 = vadd.f32 %v644_v56, %v643_v54 }
 0x11c   : > { %v677_v62 = vrot.slane %v676_v59, 2 }
 0x11d   : > { %v646_v61 = vrot.slane %v645_v58, 1 }
 0x11e   : > { %v678_v3 = vadd.f32 %v677_v62, %v676_v59 }
 0x11f   : > { %v647_v2 = vadd.f32 %v646_v61, %v645_v58 }
 0x120   : > { %v679_v5 = vrot.slane %v678_v3, 1 }
 0x121   : > { %v648_v4 = vadd.f32 %v647_v2, %v625_v1 }
 0x122   : > { %v680_v7 = vadd.f32 %v679_v5, %v678_v3 }
 0x123   : > { %650 = vst.msk [vmem:[%s1293_s12] sm:$0x1] %vm649_vm7, %v648_v4 }
 0x124   : > { %v681_v8 = vadd.f32 %v680_v7, %v651_v6 }
 0x126   : > { %682 = vst.msk [vmem:[%s1306_s24] sm:$0x1] %vm649_vm7, %v681_v8 }
 0x127 PF: > { %p1032_p11 = scmp.le.s32.totalorder %s1365_s19, 63 }
 0x129   : > { %685 = sbr.rel (%p1032_p11) target bundleno = 341 (0x155), region = 44 }
 0x12e   : > { %v1447_v9 = vstv %s1022_s2  ;;  %vm766_vm8 = vcmask 257024   ;;  %vm776_vm9 = vcmask 261120   ;;  %v686_v10 = vadd.s32 8, %v1324_v19 }
 0x12f   : > { %v694_v11 = vadd.s32 %v1447_v9, %v1324_v19  ;;  %v687_v12 = vadd.s32 16, %v1324_v19  ;;  %v688_v13 = vadd.s32 24, %v1324_v19  ;;  %v689_v14 = vadd.s32 32, %v1324_v19 }
 0x130   : > { %v695_v15 = vadd.s32 %v1447_v9, %v686_v10  ;;  %v690_v16 = vadd.s32 40, %v1324_v19  ;;  %v691_v17 = vadd.s32 48, %v1324_v19  ;;  %v692_v18 = vadd.s32 56, %v1324_v19 }
 0x131   : > { %vm702_vm10 = vcmp.lt.s32.totalorder %v694_v11, 63  ;;  %v696_v20 = vadd.s32 %v1447_v9, %v687_v12  ;;  %v697_v21 = vadd.s32 %v1447_v9, %v688_v13  ;;  %v698_v22 = vadd.s32 %v1447_v9, %v689_v14 }
 0x132   : > { %v726_v23 = vsel %vm702_vm10, %v1333_v36, 0.0  ;;  %vm703_vm11 = vcmp.lt.s32.totalorder %v695_v15, 63  ;;  %v699_v24 = vadd.s32 %v1447_v9, %v690_v16  ;;  %v700_v25 = vadd.s32 %v1447_v9, %v691_v17 }
 0x133   : > { %v1058_v26 = vpack.c.bf16 %v726_v23, %v726_v23  ;;  %v777_v27 = vsel %vm776_vm9, %v726_v23, 0.0  ;;  %v802_v19 = vmul.f32 %v726_v23, %v726_v23  ;;  %v727_v28 = vsel %vm703_vm11, %v1341_v45, 0.0 }
 0x134   : > { %v1059_v29 = vpack.c.bf16 %v727_v28, %v727_v28  ;;  %v778_v30 = vsel %vm776_vm9, %v727_v28, 0.0  ;;  %v803_v32 = vmul.f32 %v727_v28, %v727_v28  ;;  %vm704_vm12 = vcmp.lt.s32.totalorder %v696_v20, 63 }
 0x135   : > { %767 = vst.msk [vmem:[%s1301_s29] sm:$0xf] %vm766_vm8, %v1058_v26  ;;  %v810_v36 = vsel %vm776_vm9, %v802_v19, 0.0  ;;  %v779_v33 = vadd.f32 %v778_v30, %v777_v27  ;;  %v728_v34 = vsel %vm704_vm12, %v1329_v31, 0.0  ;;  %vm705_vm13 = vcmp.lt.s32.totalorder %v697_v21, 63 }
 0x136   : > { %768 = vst.msk [vmem:[%s1301_s29 + $0x4] sm:$0xf] %vm766_vm8, %v1059_v29  ;;  %v811_v35 = vsel %vm776_vm9, %v803_v32, 0.0  ;;  %v1060_v37 = vpack.c.bf16 %v728_v34, %v728_v34  ;;  %v780_v45 = vsel %vm776_vm9, %v728_v34, 0.0  ;;  %v804_v38 = vmul.f32 %v728_v34, %v728_v34  ;;  %v801_v19 = vld [vmem:[%s1306_s24] sm:$0x1] }
 0x137   : > { %v812_v39 = vadd.f32 %v811_v35, %v810_v36  ;;  %v781_v41 = vadd.f32 %v780_v45, %v779_v33  ;;  %v729_v42 = vsel %vm705_vm13, %v1337_v40, 0.0  ;;  %vm706_vm14 = vcmp.lt.s32.totalorder %v698_v22, 63 }
 0x138   : > { %769 = vst.msk [vmem:[%s1301_s29 + $0x8] sm:$0xf] %vm766_vm8, %v1060_v37  ;;  %v813_v43 = vsel %vm776_vm9, %v804_v38, 0.0  ;;  %v1061_v31 = vpack.c.bf16 %v729_v42, %v729_v42  ;;  %v782_v44 = vsel %vm776_vm9, %v729_v42, 0.0  ;;  %v805_v46 = vmul.f32 %v729_v42, %v729_v42 }
 0x139   : > { %v814_v47 = vadd.f32 %v813_v43, %v812_v39  ;;  %v783_v48 = vadd.f32 %v782_v44, %v781_v41  ;;  %v730_v49 = vsel %vm706_vm14, %v1345_v52, 0.0  ;;  %vm707_vm15 = vcmp.lt.s32.totalorder %v699_v24, 63 }
 0x13a   : > { %770 = vst.msk [vmem:[%s1301_s29 + $0xc] sm:$0xf] %vm766_vm8, %v1061_v31  ;;  %v815_v50 = vsel %vm776_vm9, %v805_v46, 0.0  ;;  %v1062_v40 = vpack.c.bf16 %v730_v49, %v730_v49  ;;  %v784_v51 = vsel %vm776_vm9, %v730_v49, 0.0  ;;  %v806_v53 = vmul.f32 %v730_v49, %v730_v49 }
 0x13b   : > { %v816_v54 = vadd.f32 %v815_v50, %v814_v47  ;;  %v785_v55 = vadd.f32 %v784_v51, %v783_v48  ;;  %v731_v56 = vsel %vm707_vm15, %v1349_v60, 0.0  ;;  %vm708_vm0 = vcmp.lt.s32.totalorder %v700_v25, 63  ;;  %v775_v25 = vld [vmem:[%s1293_s12] sm:$0x1] }
 0x13c   : > { %771 = vst.msk [vmem:[%s1301_s29 + $0x10] sm:$0xf] %vm766_vm8, %v1062_v40  ;;  %v817_v57 = vsel %vm776_vm9, %v806_v53, 0.0  ;;  %v1063_v52 = vpack.c.bf16 %v731_v56, %v731_v56  ;;  %v786_v58 = vsel %vm776_vm9, %v731_v56, 0.0  ;;  %v807_v59 = vmul.f32 %v731_v56, %v731_v56 }
 0x13d   : > { %v818_v61 = vadd.f32 %v817_v57, %v816_v54  ;;  %v787_v62 = vadd.f32 %v786_v58, %v785_v55  ;;  %v732_v1 = vsel %vm708_vm0, %v1355_v63, 0.0  ;;  %v701_v2 = vadd.s32 %v1447_v9, %v692_v18 }
 0x13e   : > { %772 = vst.msk [vmem:[%s1301_s29 + $0x14] sm:$0xf] %vm766_vm8, %v1063_v52  ;;  %v819_v60 = vsel %vm776_vm9, %v807_v59, 0.0  ;;  %v1064_v3 = vpack.c.bf16 %v732_v1, %v732_v1  ;;  %v788_v4 = vsel %vm776_vm9, %v732_v1, 0.0  ;;  %v808_v5 = vmul.f32 %v732_v1, %v732_v1 }
 0x13f   : > { %v820_v6 = vadd.f32 %v819_v60, %v818_v61  ;;  %v789_v7 = vadd.f32 %v788_v4, %v787_v62  ;;  %vm709_vm1 = vcmp.lt.s32.totalorder %v701_v2, 63  ;;  %vm799_vm2 = vcmask 253952  }
 0x140   : > { %773 = vst.msk [vmem:[%s1301_s29 + $0x18] sm:$0xf] %vm766_vm8, %v1064_v3  ;;  %v821_v8 = vsel %vm776_vm9, %v808_v5, 0.0  ;;  %v733_v63 = vsel %vm709_vm1, %v1357_v0, 0.0 }
 0x141   : > { %v822_v10 = vadd.f32 %v821_v8, %v820_v6  ;;  %v1065_v9 = vpack.c.bf16 %v733_v63, %v733_v63  ;;  %v790_v11 = vsel %vm776_vm9, %v733_v63, 0.0  ;;  %v809_v12 = vmul.f32 %v733_v63, %v733_v63 }
 0x142   : > { %v791_v13 = vadd.f32 %v790_v11, %v789_v7 }
 0x143   : > { %774 = vst.msk [vmem:[%s1301_s29 + $0x1c] sm:$0xf] %vm766_vm8, %v1065_v9  ;;  %v823_v14 = vsel %vm776_vm9, %v809_v12, 0.0 }
 0x144   : > { %v792_v15 = vrot.slane %v791_v13, 4  ;;  %v824_v16 = vadd.f32 %v823_v14, %v822_v10 }
 0x146   : > { %v793_v17 = vadd.f32 %v792_v15, %v791_v13  ;;  %v825_v18 = vrot.slane %v824_v16, 4 }
 0x148   : > { %v794_v20 = vrot.slane %v793_v17, 2  ;;  %v826_v0 = vadd.f32 %v825_v18, %v824_v16 }
 0x14a   : > { %v795_v21 = vadd.f32 %v794_v20, %v793_v17  ;;  %v827_v22 = vrot.slane %v826_v0, 2 }
 0x14c   : > { %v796_v23 = vrot.slane %v795_v21, 1  ;;  %v828_v24 = vadd.f32 %v827_v22, %v826_v0 }
 0x14e   : > { %v797_v26 = vadd.f32 %v796_v23, %v795_v21  ;;  %v829_v27 = vrot.slane %v828_v24, 1 }
 0x150   : > { %v798_v28 = vadd.f32 %v797_v26, %v775_v25  ;;  %v830_v29 = vadd.f32 %v829_v27, %v828_v24 }
 0x152   : > { %800 = vst.msk [vmem:[%s1293_s12] sm:$0x1] %vm799_vm2, %v798_v28  ;;  %v831_v30 = vadd.f32 %v830_v29, %v801_v19 }
 0x154   : > { %832 = vst.msk [vmem:[%s1306_s24] sm:$0x1] %vm799_vm2, %v831_v30 }
 0x155 PF: > { %s16_s22 = sadd.s32 1, %s1201_s22   ;;  %s1533_s30 = sld [smem:[#allocation2_spill]] }
 0x156   : > { %p13_p12 = scmp.ge.s32.totalorder %s16_s22, 6   ;;  %s1534_s18 = smov %s1193_s20 }
 0x157   : > { %s1535_s19 = smov %s1197_s21  ;;  %s1536_s20 = smov %s1539_s23 }
 0x158   :  { %15 = sbr.rel (!%p13_p12) target bundleno = 3 (0x3), region = 102 }
 0x15b   : > { %s1537_s21 = smov %s1533_s30 }

</bundles_post_ra>
